<compile_context>
chip_gen: v6e
topology: v6e:2x2x1
jax: 0.10.0
libtpu: 0.0.40
codegen_flags: <defaults>
</compile_context>

<pallas_src>
import math
import functools

import jax
import jax.numpy as jnp
from jax import lax
from jax.experimental import pallas as pl
from jax.experimental.pallas import tpu as pltpu


def _cross_attn_kernel(h, d_k,
                       q_ref, k_ref, v_ref,
                       wq_ref, bq_ref, wk_ref, bk_ref, wv_ref, bv_ref,
                       wo_ref, bo_ref,
                       o_ref):
    bt, L, D = q_ref.shape
    M = bt * L
    scale = 1.0 / math.sqrt(d_k)

    # MXU operands in bf16, f32 accumulation everywhere.
    q_in = q_ref[...].reshape(M, D).astype(jnp.bfloat16)
    k_in = k_ref[...].reshape(M, D).astype(jnp.bfloat16)
    v_in = v_ref[...].reshape(M, D).astype(jnp.bfloat16)

    # Full-width projections (full MXU columns), computed once per grid step.
    # 1/sqrt(d_k) is folded into Qp (scales (M, D) once, not h x (L, L)).
    q_p = ((jnp.dot(q_in, wq_ref[...], preferred_element_type=jnp.float32)
            + bq_ref[...]) * scale).astype(jnp.bfloat16)
    k_p = (jnp.dot(k_in, wk_ref[...], preferred_element_type=jnp.float32)
           + bk_ref[...]).astype(jnp.bfloat16)
    v_p = (jnp.dot(v_in, wv_ref[...], preferred_element_type=jnp.float32)
           + bv_ref[...]).astype(jnp.bfloat16)

    wo = wo_ref[...]        # (D, D) bf16
    bo = bo_ref[...]        # (1, D) f32

    qk_dims = (((1,), (1,)), ((), ()))   # contract last axis of both -> (Lq, Lk)

    # Batch-outer / head-inner: attention never mixes batch elements, and only
    # one head's (L, d_k)/(L, L) temporaries are live at a time.
    for b in range(bt):                  # static, unrolled
        r0 = b * L
        acc = None                       # (L, D) f32 register-value accumulator
        for hd in range(h):              # static, unrolled
            lo = hd * d_k
            qb = q_p[r0:r0 + L, lo:lo + d_k]     # static lane slices of activations
            kb = k_p[r0:r0 + L, lo:lo + d_k]
            vb = v_p[r0:r0 + L, lo:lo + d_k]

            # scores = (Q / sqrt(d_k)) @ K^T without materializing a transpose.
            s = lax.dot_general(qb, kb, qk_dims,
                                preferred_element_type=jnp.float32)      # (L, L)

            # Numerically stable softmax, all in f32.
            m = jnp.max(s, axis=-1, keepdims=True)
            e = jnp.exp(s - m)
            p = e * pl.reciprocal(jnp.sum(e, axis=-1, keepdims=True), approx=True)

            o_h = jnp.dot(p.astype(jnp.bfloat16), vb,
                          preferred_element_type=jnp.float32)            # (L, d_k)

            # Head-accumulated output projection: no concat / lane shuffles.
            contrib = jnp.dot(o_h.astype(jnp.bfloat16), wo[lo:lo + d_k, :],
                              preferred_element_type=jnp.float32)        # (L, D)
            acc = contrib if acc is None else acc + contrib

        o_ref[b] = (acc + bo).astype(o_ref.dtype)    # single VMEM writeback per row slab


def _pick_batch_tile(B, L, D, weight_bytes):
    """Largest batch tile that (a) keeps a >=2-step parallel grid for v7x's two
    TensorCores, (b) fits a conservative ~48 MiB VMEM budget, (c) prefers the
    smallest tile reaching >=512 MXU rows per step."""
    budget = 48 * 1024 * 1024
    best = 1
    for bt in range(1, B + 1):
        if B % bt:
            continue
        if B >= 2 and B // bt < 2:
            continue
        act = 3 * 2 * bt * L * D * 4       # q/k/v f32 double buffers
        out = 2 * bt * L * D * 4           # output double buffer
        inter = 6 * bt * L * D * 4         # projected activations (f32 + bf16, rough)
        if act + out + inter + weight_bytes > budget:
            continue
        best = bt
        if bt * L >= 512:
            break
    return best


def _make_call(h, d_k, B, L, D, bt, out_dtype, *, single_buffer_weights, vmem_limit):
    kernel = functools.partial(_cross_attn_kernel, h, d_k)
    seq_spec = pl.BlockSpec((bt, L, D), lambda i: (i, 0, 0))
    if single_buffer_weights:
        # Constant index_map -> double-buffering buys nothing; halve weight VMEM.
        w_spec = pl.BlockSpec((D, D), lambda i: (0, 0), pipeline_mode=pl.Buffered(1))
        b_spec = pl.BlockSpec((1, D), lambda i: (0, 0), pipeline_mode=pl.Buffered(1))
    else:
        w_spec = pl.BlockSpec((D, D), lambda i: (0, 0))
        b_spec = pl.BlockSpec((1, D), lambda i: (0, 0))
    return pl.pallas_call(
        kernel,
        out_shape=jax.ShapeDtypeStruct((B, L, D), out_dtype),
        grid_spec=pltpu.PrefetchScalarGridSpec(
            num_scalar_prefetch=0,
            grid=(B // bt,),
            in_specs=[seq_spec, seq_spec, seq_spec,
                      w_spec, b_spec,    # Wq, bq
                      w_spec, b_spec,    # Wk, bk
                      w_spec, b_spec,    # Wv, bv
                      w_spec, b_spec],   # Wo, bo
            out_specs=seq_spec),
        compiler_params=pltpu.CompilerParams(
            dimension_semantics=("parallel",),
            vmem_limit_bytes=vmem_limit),
    )


def cross_attention2(query, key, value, params, *, h, batch_tile=None):
    """query/key/value: (B, L, D) float32.  params: (in,out) weights & (1,D) biases.
    For real workloads L should be a multiple of 8 and D a multiple of 128 so every
    tile is (sublane, lane) aligned (unaligned shapes still work, just padded)."""
    B, L, D = query.shape
    assert D % h == 0
    d_k = D // h

    # Weights as bf16 MXU operands (also halves the weight DMA / VMEM bytes).
    n_wbuf = 1  # single-buffered constant weights (2 if the fallback path is taken)
    weight_bytes = 4 * D * D * 2 * n_wbuf + 4 * 1 * D * 4 * 2

    bt = batch_tile if batch_tile is not None else _pick_batch_tile(B, L, D, weight_bytes)
    assert B % bt == 0

    # Only raise the scoped-VMEM limit when the residents actually need it.
    est = (3 * 2 + 2 + 6) * bt * L * D * 4 + weight_bytes
    vmem_limit = None
    if est > 32 * 1024 * 1024:
        vmem_limit = min(int(est * 1.25), 64 * 1024 * 1024)

    def bf16(w):
        return w.astype(jnp.bfloat16)

    args = (query, key, value,
            bf16(params["wq"]), params["bq"],
            bf16(params["wk"]), params["bk"],
            bf16(params["wv"]), params["bv"],
            bf16(params["wo"]), params["bo"])

    try:
        call = _make_call(h, d_k, B, L, D, bt, query.dtype,
                          single_buffer_weights=True, vmem_limit=vmem_limit)
        return call(*args)
    except Exception:
        # Fallback if this jax version rejects pipeline_mode=pl.Buffered(1);
        # identical kernel, default double-buffered constant weights.
        call = _make_call(h, d_k, B, L, D, bt, query.dtype,
                          single_buffer_weights=False, vmem_limit=vmem_limit)
        return call(*args)


def _reference(query, key, value, params, *, h):
    """Pure-JAX f32 replica of the PyTorch forward (mask=None, eval mode)."""
    B, L, D = query.shape
    d_k = D // h

    def lin(x, w, b):
        return x @ w + b

    def split_heads(x):  # (B, L, D) -> (B, h, L, d_k)
        return x.reshape(B, L, h, d_k).transpose(0, 2, 1, 3)

    Q = split_heads(lin(query, params["wq"], params["bq"][0]))
    K = split_heads(lin(key,   params["wk"], params["bk"][0]))
    V = split_heads(lin(value, params["wv"], params["bv"][0]))

    scores = jnp.einsum("bhqd,bhkd->bhqk", Q, K) / math.sqrt(d_k)
    p = jax.nn.softmax(scores, axis=-1)
    x = jnp.einsum("bhqk,bhkd->bhqd", p, V)
    x = x.transpose(0, 2, 1, 3).reshape(B, L, D)
    return lin(x, params["wo"], params["bo"][0])


if __name__ == "__main__":
    # (8,128)-aligned small shapes: batch=2, seq=8, d_model=128, heads=4.
    B, L, D, H = 2, 8, 128, 4

    key0 = jax.random.PRNGKey(0)
    keys = jax.random.split(key0, 12)

    scale = 1.0 / math.sqrt(D)
    params = {
        "wq": jax.random.uniform(keys[0], (D, D), jnp.float32, -scale, scale),
        "bq": jax.random.uniform(keys[1], (1, D), jnp.float32, -scale, scale),
        "wk": jax.random.uniform(keys[2], (D, D), jnp.float32, -scale, scale),
        "bk": jax.random.uniform(keys[3], (1, D), jnp.float32, -scale, scale),
        "wv": jax.random.uniform(keys[4], (D, D), jnp.float32, -scale, scale),
        "bv": jax.random.uniform(keys[5], (1, D), jnp.float32, -scale, scale),
        "wo": jax.random.uniform(keys[6], (D, D), jnp.float32, -scale, scale),
        "bo": jax.random.uniform(keys[7], (1, D), jnp.float32, -scale, scale),
    }

    query = jax.random.normal(keys[8], (B, L, D), jnp.float32)
    key_ = jax.random.normal(keys[9], (B, L, D), jnp.float32)
    value = jax.random.normal(keys[10], (B, L, D), jnp.float32)

    ref = _reference(query, key_, value, params, h=H)

    # Auto batch_tile -> bt=1, 2-step "parallel" grid (uses both v7x TensorCores).
    out = cross_attention2(query, key_, value, params, h=H)
    out = jax.block_until_ready(out)
    assert out.shape == (B, L, D)
    # bf16 MXU operands + approx reciprocal -> loosened tolerance vs f32 reference.
    assert jnp.allclose(out, ref, atol=5e-2, rtol=5e-2), "mismatch (auto batch_tile)"

    # Explicit batch_tile=2: whole (tiny) batch folded into one block.
    out2 = cross_attention2(query, key_, value, params, h=H, batch_tile=2)
    out2 = jax.block_until_ready(out2)
    assert jnp.allclose(out2, ref, atol=5e-2, rtol=5e-2), "mismatch (batch_tile=2)"

    print("KERNEL_OK")
</pallas_src>

<mosaic_0001>
module attributes {stable_mosaic.version = 11 : i64} {
  func.func @_cross_attn_kernel(%arg0: i32, %arg1: memref<1x8x128xf32, #tpu.memory_space<vmem>>, %arg2: memref<1x8x128xf32, #tpu.memory_space<vmem>>, %arg3: memref<1x8x128xf32, #tpu.memory_space<vmem>>, %arg4: memref<128x128xbf16, #tpu.memory_space<vmem>>, %arg5: memref<1x128xf32, #tpu.memory_space<vmem>>, %arg6: memref<128x128xbf16, #tpu.memory_space<vmem>>, %arg7: memref<1x128xf32, #tpu.memory_space<vmem>>, %arg8: memref<128x128xbf16, #tpu.memory_space<vmem>>, %arg9: memref<1x128xf32, #tpu.memory_space<vmem>>, %arg10: memref<128x128xbf16, #tpu.memory_space<vmem>>, %arg11: memref<1x128xf32, #tpu.memory_space<vmem>>, %arg12: memref<1x8x128xf32, #tpu.memory_space<vmem>>) attributes {dimension_semantics = [#tpu.dimension_semantics<parallel>], iteration_bounds = array<i64: 2>, scalar_prefetch = 0 : i64, scratch_operands = 0 : i64, tpu.core_type = #tpu.core_type<tc>, window_params = [{transform_indices = @transform_0, window_bounds = array<i64: 1, 8, 128>}, {transform_indices = @transform_1, window_bounds = array<i64: 1, 8, 128>}, {transform_indices = @transform_2, window_bounds = array<i64: 1, 8, 128>}, {pipeline_mode = #tpu.pipeline_mode<synchronous>, transform_indices = @transform_3, window_bounds = array<i64: 128, 128>}, {pipeline_mode = #tpu.pipeline_mode<synchronous>, transform_indices = @transform_4, window_bounds = array<i64: 1, 128>}, {pipeline_mode = #tpu.pipeline_mode<synchronous>, transform_indices = @transform_5, window_bounds = array<i64: 128, 128>}, {pipeline_mode = #tpu.pipeline_mode<synchronous>, transform_indices = @transform_6, window_bounds = array<i64: 1, 128>}, {pipeline_mode = #tpu.pipeline_mode<synchronous>, transform_indices = @transform_7, window_bounds = array<i64: 128, 128>}, {pipeline_mode = #tpu.pipeline_mode<synchronous>, transform_indices = @transform_8, window_bounds = array<i64: 1, 128>}, {pipeline_mode = #tpu.pipeline_mode<synchronous>, transform_indices = @transform_9, window_bounds = array<i64: 128, 128>}, {pipeline_mode = #tpu.pipeline_mode<synchronous>, transform_indices = @transform_10, window_bounds = array<i64: 1, 128>}, {transform_indices = @transform_11, window_bounds = array<i64: 1, 8, 128>}]} {
    %c0 = arith.constant 0 : index
    %c0_0 = arith.constant 0 : index
    %c0_1 = arith.constant 0 : index
    %0 = vector.load %arg1[%c0, %c0_0, %c0_1] : memref<1x8x128xf32, #tpu.memory_space<vmem>>, vector<1x8x128xf32>
    %1 = vector.shape_cast %0 : vector<1x8x128xf32> to vector<8x128xf32>
    %2 = arith.truncf %1 : vector<8x128xf32> to vector<8x128xbf16>
    %c0_2 = arith.constant 0 : index
    %c0_3 = arith.constant 0 : index
    %c0_4 = arith.constant 0 : index
    %3 = vector.load %arg2[%c0_2, %c0_3, %c0_4] : memref<1x8x128xf32, #tpu.memory_space<vmem>>, vector<1x8x128xf32>
    %4 = vector.shape_cast %3 : vector<1x8x128xf32> to vector<8x128xf32>
    %5 = arith.truncf %4 : vector<8x128xf32> to vector<8x128xbf16>
    %c0_5 = arith.constant 0 : index
    %c0_6 = arith.constant 0 : index
    %c0_7 = arith.constant 0 : index
    %6 = vector.load %arg3[%c0_5, %c0_6, %c0_7] : memref<1x8x128xf32, #tpu.memory_space<vmem>>, vector<1x8x128xf32>
    %7 = vector.shape_cast %6 : vector<1x8x128xf32> to vector<8x128xf32>
    %8 = arith.truncf %7 : vector<8x128xf32> to vector<8x128xbf16>
    %c0_8 = arith.constant 0 : index
    %c0_9 = arith.constant 0 : index
    %9 = vector.load %arg4[%c0_8, %c0_9] : memref<128x128xbf16, #tpu.memory_space<vmem>>, vector<128x128xbf16>
    %cst = arith.constant dense<0.000000e+00> : vector<8x128xf32>
    %10 = tpu.matmul %2, %9, %cst {dimension_numbers = #tpu.dot_dimension_numbers<[1], [0], [0], [1], [0, 0, 1, 1], [], []>} : vector<8x128xbf16>, vector<128x128xbf16>, vector<8x128xf32> -> vector<8x128xf32>
    %c0_10 = arith.constant 0 : index
    %c0_11 = arith.constant 0 : index
    %11 = vector.load %arg5[%c0_10, %c0_11] : memref<1x128xf32, #tpu.memory_space<vmem>>, vector<1x128xf32>
    %12 = vector.broadcast %11 : vector<1x128xf32> to vector<8x128xf32>
    %13 = arith.addf %10, %12 : vector<8x128xf32>
    %cst_12 = arith.constant 0.176776692 : f32
    %14 = vector.broadcast %cst_12 : f32 to vector<8x128xf32>
    %15 = arith.mulf %13, %14 : vector<8x128xf32>
    %16 = arith.truncf %15 : vector<8x128xf32> to vector<8x128xbf16>
    %c0_13 = arith.constant 0 : index
    %c0_14 = arith.constant 0 : index
    %17 = vector.load %arg6[%c0_13, %c0_14] : memref<128x128xbf16, #tpu.memory_space<vmem>>, vector<128x128xbf16>
    %cst_15 = arith.constant dense<0.000000e+00> : vector<8x128xf32>
    %18 = tpu.matmul %5, %17, %cst_15 {dimension_numbers = #tpu.dot_dimension_numbers<[1], [0], [0], [1], [0, 0, 1, 1], [], []>} : vector<8x128xbf16>, vector<128x128xbf16>, vector<8x128xf32> -> vector<8x128xf32>
    %c0_16 = arith.constant 0 : index
    %c0_17 = arith.constant 0 : index
    %19 = vector.load %arg7[%c0_16, %c0_17] : memref<1x128xf32, #tpu.memory_space<vmem>>, vector<1x128xf32>
    %20 = vector.broadcast %19 : vector<1x128xf32> to vector<8x128xf32>
    %21 = arith.addf %18, %20 : vector<8x128xf32>
    %22 = arith.truncf %21 : vector<8x128xf32> to vector<8x128xbf16>
    %c0_18 = arith.constant 0 : index
    %c0_19 = arith.constant 0 : index
    %23 = vector.load %arg8[%c0_18, %c0_19] : memref<128x128xbf16, #tpu.memory_space<vmem>>, vector<128x128xbf16>
    %cst_20 = arith.constant dense<0.000000e+00> : vector<8x128xf32>
    %24 = tpu.matmul %8, %23, %cst_20 {dimension_numbers = #tpu.dot_dimension_numbers<[1], [0], [0], [1], [0, 0, 1, 1], [], []>} : vector<8x128xbf16>, vector<128x128xbf16>, vector<8x128xf32> -> vector<8x128xf32>
    %c0_21 = arith.constant 0 : index
    %c0_22 = arith.constant 0 : index
    %25 = vector.load %arg9[%c0_21, %c0_22] : memref<1x128xf32, #tpu.memory_space<vmem>>, vector<1x128xf32>
    %26 = vector.broadcast %25 : vector<1x128xf32> to vector<8x128xf32>
    %27 = arith.addf %24, %26 : vector<8x128xf32>
    %28 = arith.truncf %27 : vector<8x128xf32> to vector<8x128xbf16>
    %c0_23 = arith.constant 0 : index
    %c0_24 = arith.constant 0 : index
    %29 = vector.load %arg10[%c0_23, %c0_24] : memref<128x128xbf16, #tpu.memory_space<vmem>>, vector<128x128xbf16>
    %c0_25 = arith.constant 0 : index
    %c0_26 = arith.constant 0 : index
    %30 = vector.load %arg11[%c0_25, %c0_26] : memref<1x128xf32, #tpu.memory_space<vmem>>, vector<1x128xf32>
    %31 = vector.extract_strided_slice %16 {offsets = [0, 0], sizes = [8, 32], strides = [1, 1]} : vector<8x128xbf16> to vector<8x32xbf16>
    %32 = vector.extract_strided_slice %22 {offsets = [0, 0], sizes = [8, 32], strides = [1, 1]} : vector<8x128xbf16> to vector<8x32xbf16>
    %33 = vector.extract_strided_slice %28 {offsets = [0, 0], sizes = [8, 32], strides = [1, 1]} : vector<8x128xbf16> to vector<8x32xbf16>
    %cst_27 = arith.constant dense<0.000000e+00> : vector<8x8xf32>
    %34 = tpu.matmul %31, %32, %cst_27 {dimension_numbers = #tpu.dot_dimension_numbers<[1], [1], [0], [0], [0, 0, 1, 0], [], []>} : vector<8x32xbf16>, vector<8x32xbf16>, vector<8x8xf32> -> vector<8x8xf32>
    %cst_28 = arith.constant dense<0xFF800000> : vector<8xf32>
    %35 = vector.multi_reduction <maximumf>, %34, %cst_28 [1] : vector<8x8xf32> to vector<8xf32>
    %36 = vector.shape_cast %35 : vector<8xf32> to vector<8x1xf32>
    %37 = vector.broadcast %36 : vector<8x1xf32> to vector<8x8xf32>
    %38 = arith.subf %34, %37 : vector<8x8xf32>
    %39 = math.exp %38 : vector<8x8xf32>
    %cst_29 = arith.constant dense<0.000000e+00> : vector<8xf32>
    %40 = vector.multi_reduction <add>, %39, %cst_29 [1] : vector<8x8xf32> to vector<8xf32>
    %41 = vector.shape_cast %40 : vector<8xf32> to vector<8x1xf32>
    %42 = tpu.reciprocal %41 {approx = true} : vector<8x1xf32> -> vector<8x1xf32>
    %43 = vector.broadcast %42 : vector<8x1xf32> to vector<8x8xf32>
    %44 = arith.mulf %39, %43 : vector<8x8xf32>
    %45 = arith.truncf %44 : vector<8x8xf32> to vector<8x8xbf16>
    %cst_30 = arith.constant dense<0.000000e+00> : vector<8x32xf32>
    %46 = tpu.matmul %45, %33, %cst_30 {dimension_numbers = #tpu.dot_dimension_numbers<[1], [0], [0], [1], [0, 0, 1, 1], [], []>} : vector<8x8xbf16>, vector<8x32xbf16>, vector<8x32xf32> -> vector<8x32xf32>
    %47 = arith.truncf %46 : vector<8x32xf32> to vector<8x32xbf16>
    %48 = vector.extract_strided_slice %29 {offsets = [0, 0], sizes = [32, 128], strides = [1, 1]} : vector<128x128xbf16> to vector<32x128xbf16>
    %cst_31 = arith.constant dense<0.000000e+00> : vector<8x128xf32>
    %49 = tpu.matmul %47, %48, %cst_31 {dimension_numbers = #tpu.dot_dimension_numbers<[1], [0], [0], [1], [0, 0, 1, 1], [], []>} : vector<8x32xbf16>, vector<32x128xbf16>, vector<8x128xf32> -> vector<8x128xf32>
    %50 = vector.extract_strided_slice %16 {offsets = [0, 32], sizes = [8, 32], strides = [1, 1]} : vector<8x128xbf16> to vector<8x32xbf16>
    %51 = vector.extract_strided_slice %22 {offsets = [0, 32], sizes = [8, 32], strides = [1, 1]} : vector<8x128xbf16> to vector<8x32xbf16>
    %52 = vector.extract_strided_slice %28 {offsets = [0, 32], sizes = [8, 32], strides = [1, 1]} : vector<8x128xbf16> to vector<8x32xbf16>
    %cst_32 = arith.constant dense<0.000000e+00> : vector<8x8xf32>
    %53 = tpu.matmul %50, %51, %cst_32 {dimension_numbers = #tpu.dot_dimension_numbers<[1], [1], [0], [0], [0, 0, 1, 0], [], []>} : vector<8x32xbf16>, vector<8x32xbf16>, vector<8x8xf32> -> vector<8x8xf32>
    %cst_33 = arith.constant dense<0xFF800000> : vector<8xf32>
    %54 = vector.multi_reduction <maximumf>, %53, %cst_33 [1] : vector<8x8xf32> to vector<8xf32>
    %55 = vector.shape_cast %54 : vector<8xf32> to vector<8x1xf32>
    %56 = vector.broadcast %55 : vector<8x1xf32> to vector<8x8xf32>
    %57 = arith.subf %53, %56 : vector<8x8xf32>
    %58 = math.exp %57 : vector<8x8xf32>
    %cst_34 = arith.constant dense<0.000000e+00> : vector<8xf32>
    %59 = vector.multi_reduction <add>, %58, %cst_34 [1] : vector<8x8xf32> to vector<8xf32>
    %60 = vector.shape_cast %59 : vector<8xf32> to vector<8x1xf32>
    %61 = tpu.reciprocal %60 {approx = true} : vector<8x1xf32> -> vector<8x1xf32>
    %62 = vector.broadcast %61 : vector<8x1xf32> to vector<8x8xf32>
    %63 = arith.mulf %58, %62 : vector<8x8xf32>
    %64 = arith.truncf %63 : vector<8x8xf32> to vector<8x8xbf16>
    %cst_35 = arith.constant dense<0.000000e+00> : vector<8x32xf32>
    %65 = tpu.matmul %64, %52, %cst_35 {dimension_numbers = #tpu.dot_dimension_numbers<[1], [0], [0], [1], [0, 0, 1, 1], [], []>} : vector<8x8xbf16>, vector<8x32xbf16>, vector<8x32xf32> -> vector<8x32xf32>
    %66 = arith.truncf %65 : vector<8x32xf32> to vector<8x32xbf16>
    %67 = vector.extract_strided_slice %29 {offsets = [32, 0], sizes = [32, 128], strides = [1, 1]} : vector<128x128xbf16> to vector<32x128xbf16>
    %cst_36 = arith.constant dense<0.000000e+00> : vector<8x128xf32>
    %68 = tpu.matmul %66, %67, %cst_36 {dimension_numbers = #tpu.dot_dimension_numbers<[1], [0], [0], [1], [0, 0, 1, 1], [], []>} : vector<8x32xbf16>, vector<32x128xbf16>, vector<8x128xf32> -> vector<8x128xf32>
    %69 = arith.addf %49, %68 : vector<8x128xf32>
    %70 = vector.extract_strided_slice %16 {offsets = [0, 64], sizes = [8, 32], strides = [1, 1]} : vector<8x128xbf16> to vector<8x32xbf16>
    %71 = vector.extract_strided_slice %22 {offsets = [0, 64], sizes = [8, 32], strides = [1, 1]} : vector<8x128xbf16> to vector<8x32xbf16>
    %72 = vector.extract_strided_slice %28 {offsets = [0, 64], sizes = [8, 32], strides = [1, 1]} : vector<8x128xbf16> to vector<8x32xbf16>
    %cst_37 = arith.constant dense<0.000000e+00> : vector<8x8xf32>
    %73 = tpu.matmul %70, %71, %cst_37 {dimension_numbers = #tpu.dot_dimension_numbers<[1], [1], [0], [0], [0, 0, 1, 0], [], []>} : vector<8x32xbf16>, vector<8x32xbf16>, vector<8x8xf32> -> vector<8x8xf32>
    %cst_38 = arith.constant dense<0xFF800000> : vector<8xf32>
    %74 = vector.multi_reduction <maximumf>, %73, %cst_38 [1] : vector<8x8xf32> to vector<8xf32>
    %75 = vector.shape_cast %74 : vector<8xf32> to vector<8x1xf32>
    %76 = vector.broadcast %75 : vector<8x1xf32> to vector<8x8xf32>
    %77 = arith.subf %73, %76 : vector<8x8xf32>
    %78 = math.exp %77 : vector<8x8xf32>
    %cst_39 = arith.constant dense<0.000000e+00> : vector<8xf32>
    %79 = vector.multi_reduction <add>, %78, %cst_39 [1] : vector<8x8xf32> to vector<8xf32>
    %80 = vector.shape_cast %79 : vector<8xf32> to vector<8x1xf32>
    %81 = tpu.reciprocal %80 {approx = true} : vector<8x1xf32> -> vector<8x1xf32>
    %82 = vector.broadcast %81 : vector<8x1xf32> to vector<8x8xf32>
    %83 = arith.mulf %78, %82 : vector<8x8xf32>
    %84 = arith.truncf %83 : vector<8x8xf32> to vector<8x8xbf16>
    %cst_40 = arith.constant dense<0.000000e+00> : vector<8x32xf32>
    %85 = tpu.matmul %84, %72, %cst_40 {dimension_numbers = #tpu.dot_dimension_numbers<[1], [0], [0], [1], [0, 0, 1, 1], [], []>} : vector<8x8xbf16>, vector<8x32xbf16>, vector<8x32xf32> -> vector<8x32xf32>
    %86 = arith.truncf %85 : vector<8x32xf32> to vector<8x32xbf16>
    %87 = vector.extract_strided_slice %29 {offsets = [64, 0], sizes = [32, 128], strides = [1, 1]} : vector<128x128xbf16> to vector<32x128xbf16>
    %cst_41 = arith.constant dense<0.000000e+00> : vector<8x128xf32>
    %88 = tpu.matmul %86, %87, %cst_41 {dimension_numbers = #tpu.dot_dimension_numbers<[1], [0], [0], [1], [0, 0, 1, 1], [], []>} : vector<8x32xbf16>, vector<32x128xbf16>, vector<8x128xf32> -> vector<8x128xf32>
    %89 = arith.addf %69, %88 : vector<8x128xf32>
    %90 = vector.extract_strided_slice %16 {offsets = [0, 96], sizes = [8, 32], strides = [1, 1]} : vector<8x128xbf16> to vector<8x32xbf16>
    %91 = vector.extract_strided_slice %22 {offsets = [0, 96], sizes = [8, 32], strides = [1, 1]} : vector<8x128xbf16> to vector<8x32xbf16>
    %92 = vector.extract_strided_slice %28 {offsets = [0, 96], sizes = [8, 32], strides = [1, 1]} : vector<8x128xbf16> to vector<8x32xbf16>
    %cst_42 = arith.constant dense<0.000000e+00> : vector<8x8xf32>
    %93 = tpu.matmul %90, %91, %cst_42 {dimension_numbers = #tpu.dot_dimension_numbers<[1], [1], [0], [0], [0, 0, 1, 0], [], []>} : vector<8x32xbf16>, vector<8x32xbf16>, vector<8x8xf32> -> vector<8x8xf32>
    %cst_43 = arith.constant dense<0xFF800000> : vector<8xf32>
    %94 = vector.multi_reduction <maximumf>, %93, %cst_43 [1] : vector<8x8xf32> to vector<8xf32>
    %95 = vector.shape_cast %94 : vector<8xf32> to vector<8x1xf32>
    %96 = vector.broadcast %95 : vector<8x1xf32> to vector<8x8xf32>
    %97 = arith.subf %93, %96 : vector<8x8xf32>
    %98 = math.exp %97 : vector<8x8xf32>
    %cst_44 = arith.constant dense<0.000000e+00> : vector<8xf32>
    %99 = vector.multi_reduction <add>, %98, %cst_44 [1] : vector<8x8xf32> to vector<8xf32>
    %100 = vector.shape_cast %99 : vector<8xf32> to vector<8x1xf32>
    %101 = tpu.reciprocal %100 {approx = true} : vector<8x1xf32> -> vector<8x1xf32>
    %102 = vector.broadcast %101 : vector<8x1xf32> to vector<8x8xf32>
    %103 = arith.mulf %98, %102 : vector<8x8xf32>
    %104 = arith.truncf %103 : vector<8x8xf32> to vector<8x8xbf16>
    %cst_45 = arith.constant dense<0.000000e+00> : vector<8x32xf32>
    %105 = tpu.matmul %104, %92, %cst_45 {dimension_numbers = #tpu.dot_dimension_numbers<[1], [0], [0], [1], [0, 0, 1, 1], [], []>} : vector<8x8xbf16>, vector<8x32xbf16>, vector<8x32xf32> -> vector<8x32xf32>
    %106 = arith.truncf %105 : vector<8x32xf32> to vector<8x32xbf16>
    %107 = vector.extract_strided_slice %29 {offsets = [96, 0], sizes = [32, 128], strides = [1, 1]} : vector<128x128xbf16> to vector<32x128xbf16>
    %cst_46 = arith.constant dense<0.000000e+00> : vector<8x128xf32>
    %108 = tpu.matmul %106, %107, %cst_46 {dimension_numbers = #tpu.dot_dimension_numbers<[1], [0], [0], [1], [0, 0, 1, 1], [], []>} : vector<8x32xbf16>, vector<32x128xbf16>, vector<8x128xf32> -> vector<8x128xf32>
    %109 = arith.addf %89, %108 : vector<8x128xf32>
    %110 = vector.broadcast %30 : vector<1x128xf32> to vector<8x128xf32>
    %111 = arith.addf %109, %110 : vector<8x128xf32>
    %c0_47 = arith.constant 0 : index
    %c0_48 = arith.constant 0 : index
    %c0_49 = arith.constant 0 : index
    %112 = vector.load %arg12[%c0_47, %c0_48, %c0_49] : memref<1x8x128xf32, #tpu.memory_space<vmem>>, vector<1x8x128xf32>
    %113 = vector.shape_cast %112 : vector<1x8x128xf32> to vector<8x128xf32>
    %114 = vector.shape_cast %111 : vector<8x128xf32> to vector<1x8x128xf32>
    tpu.vector_store %arg12[%c0_47, %c0_48, %c0_49], %114 {strides = array<i32>} : memref<1x8x128xf32, #tpu.memory_space<vmem>>, vector<1x8x128xf32>,
    return
  }
  func.func @transform_0(%arg0: i32) -> (i32, i32, i32) {
    %c0_i32 = arith.constant 0 : i32
    %c0_i32_0 = arith.constant 0 : i32
    %c0_i32_1 = arith.constant 0 : i32
    return %arg0, %c0_i32, %c0_i32_0 : i32, i32, i32
  }
  func.func @transform_1(%arg0: i32) -> (i32, i32, i32) {
    %c0_i32 = arith.constant 0 : i32
    %c0_i32_0 = arith.constant 0 : i32
    %c0_i32_1 = arith.constant 0 : i32
    return %arg0, %c0_i32, %c0_i32_0 : i32, i32, i32
  }
  func.func @transform_2(%arg0: i32) -> (i32, i32, i32) {
    %c0_i32 = arith.constant 0 : i32
    %c0_i32_0 = arith.constant 0 : i32
    %c0_i32_1 = arith.constant 0 : i32
    return %arg0, %c0_i32, %c0_i32_0 : i32, i32, i32
  }
  func.func @transform_3(%arg0: i32) -> (i32, i32) {
    %c0_i32 = arith.constant 0 : i32
    %c0_i32_0 = arith.constant 0 : i32
    %c0_i32_1 = arith.constant 0 : i32
    return %c0_i32, %c0_i32_0 : i32, i32
  }
  func.func @transform_4(%arg0: i32) -> (i32, i32) {
    %c0_i32 = arith.constant 0 : i32
    %c0_i32_0 = arith.constant 0 : i32
    %c0_i32_1 = arith.constant 0 : i32
    return %c0_i32, %c0_i32_0 : i32, i32
  }
  func.func @transform_5(%arg0: i32) -> (i32, i32) {
    %c0_i32 = arith.constant 0 : i32
    %c0_i32_0 = arith.constant 0 : i32
    %c0_i32_1 = arith.constant 0 : i32
    return %c0_i32, %c0_i32_0 : i32, i32
  }
  func.func @transform_6(%arg0: i32) -> (i32, i32) {
    %c0_i32 = arith.constant 0 : i32
    %c0_i32_0 = arith.constant 0 : i32
    %c0_i32_1 = arith.constant 0 : i32
    return %c0_i32, %c0_i32_0 : i32, i32
  }
  func.func @transform_7(%arg0: i32) -> (i32, i32) {
    %c0_i32 = arith.constant 0 : i32
    %c0_i32_0 = arith.constant 0 : i32
    %c0_i32_1 = arith.constant 0 : i32
    return %c0_i32, %c0_i32_0 : i32, i32
  }
  func.func @transform_8(%arg0: i32) -> (i32, i32) {
    %c0_i32 = arith.constant 0 : i32
    %c0_i32_0 = arith.constant 0 : i32
    %c0_i32_1 = arith.constant 0 : i32
    return %c0_i32, %c0_i32_0 : i32, i32
  }
  func.func @transform_9(%arg0: i32) -> (i32, i32) {
    %c0_i32 = arith.constant 0 : i32
    %c0_i32_0 = arith.constant 0 : i32
    %c0_i32_1 = arith.constant 0 : i32
    return %c0_i32, %c0_i32_0 : i32, i32
  }
  func.func @transform_10(%arg0: i32) -> (i32, i32) {
    %c0_i32 = arith.constant 0 : i32
    %c0_i32_0 = arith.constant 0 : i32
    %c0_i32_1 = arith.constant 0 : i32
    return %c0_i32, %c0_i32_0 : i32, i32
  }
  func.func @transform_11(%arg0: i32) -> (i32, i32, i32) {
    %c0_i32 = arith.constant 0 : i32
    %c0_i32_0 = arith.constant 0 : i32
    %c0_i32_1 = arith.constant 0 : i32
    return %arg0, %c0_i32, %c0_i32_0 : i32, i32, i32
  }
}

module attributes {stable_mosaic.version = 11 : i64} {
  func.func @_cross_attn_kernel(%arg0: i32, %arg1: memref<1x8x128xf32, #tpu.memory_space<vmem>>, %arg2: memref<1x8x128xf32, #tpu.memory_space<vmem>>, %arg3: memref<1x8x128xf32, #tpu.memory_space<vmem>>, %arg4: memref<128x128xbf16, #tpu.memory_space<vmem>>, %arg5: memref<1x128xf32, #tpu.memory_space<vmem>>, %arg6: memref<128x128xbf16, #tpu.memory_space<vmem>>, %arg7: memref<1x128xf32, #tpu.memory_space<vmem>>, %arg8: memref<128x128xbf16, #tpu.memory_space<vmem>>, %arg9: memref<1x128xf32, #tpu.memory_space<vmem>>, %arg10: memref<128x128xbf16, #tpu.memory_space<vmem>>, %arg11: memref<1x128xf32, #tpu.memory_space<vmem>>, %arg12: memref<1x8x128xf32, #tpu.memory_space<vmem>>) attributes {dimension_semantics = [#tpu.dimension_semantics<parallel>], iteration_bounds = array<i64: 2>, scalar_prefetch = 0 : i64, scratch_operands = 0 : i64, tpu.core_type = #tpu.core_type<tc>, window_params = [{transform_indices = @transform_0, window_bounds = array<i64: 1, 8, 128>}, {transform_indices = @transform_1, window_bounds = array<i64: 1, 8, 128>}, {transform_indices = @transform_2, window_bounds = array<i64: 1, 8, 128>}, {pipeline_mode = #tpu.pipeline_mode<synchronous>, transform_indices = @transform_3, window_bounds = array<i64: 128, 128>}, {pipeline_mode = #tpu.pipeline_mode<synchronous>, transform_indices = @transform_4, window_bounds = array<i64: 1, 128>}, {pipeline_mode = #tpu.pipeline_mode<synchronous>, transform_indices = @transform_5, window_bounds = array<i64: 128, 128>}, {pipeline_mode = #tpu.pipeline_mode<synchronous>, transform_indices = @transform_6, window_bounds = array<i64: 1, 128>}, {pipeline_mode = #tpu.pipeline_mode<synchronous>, transform_indices = @transform_7, window_bounds = array<i64: 128, 128>}, {pipeline_mode = #tpu.pipeline_mode<synchronous>, transform_indices = @transform_8, window_bounds = array<i64: 1, 128>}, {pipeline_mode = #tpu.pipeline_mode<synchronous>, transform_indices = @transform_9, window_bounds = array<i64: 128, 128>}, {pipeline_mode = #tpu.pipeline_mode<synchronous>, transform_indices = @transform_10, window_bounds = array<i64: 1, 128>}, {transform_indices = @transform_11, window_bounds = array<i64: 1, 8, 128>}]} {
    %c0 = arith.constant 0 : index
    %c0_0 = arith.constant 0 : index
    %c0_1 = arith.constant 0 : index
    %0 = vector.load %arg1[%c0, %c0_0, %c0_1] : memref<1x8x128xf32, #tpu.memory_space<vmem>>, vector<1x8x128xf32>
    %1 = vector.shape_cast %0 : vector<1x8x128xf32> to vector<8x128xf32>
    %2 = arith.truncf %1 : vector<8x128xf32> to vector<8x128xbf16>
    %c0_2 = arith.constant 0 : index
    %c0_3 = arith.constant 0 : index
    %c0_4 = arith.constant 0 : index
    %3 = vector.load %arg2[%c0_2, %c0_3, %c0_4] : memref<1x8x128xf32, #tpu.memory_space<vmem>>, vector<1x8x128xf32>
    %4 = vector.shape_cast %3 : vector<1x8x128xf32> to vector<8x128xf32>
    %5 = arith.truncf %4 : vector<8x128xf32> to vector<8x128xbf16>
    %c0_5 = arith.constant 0 : index
    %c0_6 = arith.constant 0 : index
    %c0_7 = arith.constant 0 : index
    %6 = vector.load %arg3[%c0_5, %c0_6, %c0_7] : memref<1x8x128xf32, #tpu.memory_space<vmem>>, vector<1x8x128xf32>
    %7 = vector.shape_cast %6 : vector<1x8x128xf32> to vector<8x128xf32>
    %8 = arith.truncf %7 : vector<8x128xf32> to vector<8x128xbf16>
    %c0_8 = arith.constant 0 : index
    %c0_9 = arith.constant 0 : index
    %9 = vector.load %arg4[%c0_8, %c0_9] : memref<128x128xbf16, #tpu.memory_space<vmem>>, vector<128x128xbf16>
    %cst = arith.constant dense<0.000000e+00> : vector<8x128xf32>
    %10 = tpu.matmul %2, %9, %cst {dimension_numbers = #tpu.dot_dimension_numbers<[1], [0], [0], [1], [0, 0, 1, 1], [], []>} : vector<8x128xbf16>, vector<128x128xbf16>, vector<8x128xf32> -> vector<8x128xf32>
    %c0_10 = arith.constant 0 : index
    %c0_11 = arith.constant 0 : index
    %11 = vector.load %arg5[%c0_10, %c0_11] : memref<1x128xf32, #tpu.memory_space<vmem>>, vector<1x128xf32>
    %12 = vector.broadcast %11 : vector<1x128xf32> to vector<8x128xf32>
    %13 = arith.addf %10, %12 : vector<8x128xf32>
    %cst_12 = arith.constant 0.176776692 : f32
    %14 = vector.broadcast %cst_12 : f32 to vector<8x128xf32>
    %15 = arith.mulf %13, %14 : vector<8x128xf32>
    %16 = arith.truncf %15 : vector<8x128xf32> to vector<8x128xbf16>
    %c0_13 = arith.constant 0 : index
    %c0_14 = arith.constant 0 : index
    %17 = vector.load %arg6[%c0_13, %c0_14] : memref<128x128xbf16, #tpu.memory_space<vmem>>, vector<128x128xbf16>
    %cst_15 = arith.constant dense<0.000000e+00> : vector<8x128xf32>
    %18 = tpu.matmul %5, %17, %cst_15 {dimension_numbers = #tpu.dot_dimension_numbers<[1], [0], [0], [1], [0, 0, 1, 1], [], []>} : vector<8x128xbf16>, vector<128x128xbf16>, vector<8x128xf32> -> vector<8x128xf32>
    %c0_16 = arith.constant 0 : index
    %c0_17 = arith.constant 0 : index
    %19 = vector.load %arg7[%c0_16, %c0_17] : memref<1x128xf32, #tpu.memory_space<vmem>>, vector<1x128xf32>
    %20 = vector.broadcast %19 : vector<1x128xf32> to vector<8x128xf32>
    %21 = arith.addf %18, %20 : vector<8x128xf32>
    %22 = arith.truncf %21 : vector<8x128xf32> to vector<8x128xbf16>
    %c0_18 = arith.constant 0 : index
    %c0_19 = arith.constant 0 : index
    %23 = vector.load %arg8[%c0_18, %c0_19] : memref<128x128xbf16, #tpu.memory_space<vmem>>, vector<128x128xbf16>
    %cst_20 = arith.constant dense<0.000000e+00> : vector<8x128xf32>
    %24 = tpu.matmul %8, %23, %cst_20 {dimension_numbers = #tpu.dot_dimension_numbers<[1], [0], [0], [1], [0, 0, 1, 1], [], []>} : vector<8x128xbf16>, vector<128x128xbf16>, vector<8x128xf32> -> vector<8x128xf32>
    %c0_21 = arith.constant 0 : index
    %c0_22 = arith.constant 0 : index
    %25 = vector.load %arg9[%c0_21, %c0_22] : memref<1x128xf32, #tpu.memory_space<vmem>>, vector<1x128xf32>
    %26 = vector.broadcast %25 : vector<1x128xf32> to vector<8x128xf32>
    %27 = arith.addf %24, %26 : vector<8x128xf32>
    %28 = arith.truncf %27 : vector<8x128xf32> to vector<8x128xbf16>
    %c0_23 = arith.constant 0 : index
    %c0_24 = arith.constant 0 : index
    %29 = vector.load %arg10[%c0_23, %c0_24] : memref<128x128xbf16, #tpu.memory_space<vmem>>, vector<128x128xbf16>
    %c0_25 = arith.constant 0 : index
    %c0_26 = arith.constant 0 : index
    %30 = vector.load %arg11[%c0_25, %c0_26] : memref<1x128xf32, #tpu.memory_space<vmem>>, vector<1x128xf32>
    %31 = vector.extract_strided_slice %16 {offsets = [0, 0], sizes = [8, 32], strides = [1, 1]} : vector<8x128xbf16> to vector<8x32xbf16>
    %32 = vector.extract_strided_slice %22 {offsets = [0, 0], sizes = [8, 32], strides = [1, 1]} : vector<8x128xbf16> to vector<8x32xbf16>
    %33 = vector.extract_strided_slice %28 {offsets = [0, 0], sizes = [8, 32], strides = [1, 1]} : vector<8x128xbf16> to vector<8x32xbf16>
    %cst_27 = arith.constant dense<0.000000e+00> : vector<8x8xf32>
    %34 = tpu.matmul %31, %32, %cst_27 {dimension_numbers = #tpu.dot_dimension_numbers<[1], [1], [0], [0], [0, 0, 1, 0], [], []>} : vector<8x32xbf16>, vector<8x32xbf16>, vector<8x8xf32> -> vector<8x8xf32>
    %cst_28 = arith.constant dense<0xFF800000> : vector<8xf32>
    %35 = vector.multi_reduction <maximumf>, %34, %cst_28 [1] : vector<8x8xf32> to vector<8xf32>
    %36 = vector.shape_cast %35 : vector<8xf32> to vector<8x1xf32>
    %37 = vector.broadcast %36 : vector<8x1xf32> to vector<8x8xf32>
    %38 = arith.subf %34, %37 : vector<8x8xf32>
    %39 = math.exp %38 : vector<8x8xf32>
    %cst_29 = arith.constant dense<0.000000e+00> : vector<8xf32>
    %40 = vector.multi_reduction <add>, %39, %cst_29 [1] : vector<8x8xf32> to vector<8xf32>
    %41 = vector.shape_cast %40 : vector<8xf32> to vector<8x1xf32>
    %42 = tpu.reciprocal %41 {approx = true} : vector<8x1xf32> -> vector<8x1xf32>
    %43 = vector.broadcast %42 : vector<8x1xf32> to vector<8x8xf32>
    %44 = arith.mulf %39, %43 : vector<8x8xf32>
    %45 = arith.truncf %44 : vector<8x8xf32> to vector<8x8xbf16>
    %cst_30 = arith.constant dense<0.000000e+00> : vector<8x32xf32>
    %46 = tpu.matmul %45, %33, %cst_30 {dimension_numbers = #tpu.dot_dimension_numbers<[1], [0], [0], [1], [0, 0, 1, 1], [], []>} : vector<8x8xbf16>, vector<8x32xbf16>, vector<8x32xf32> -> vector<8x32xf32>
    %47 = arith.truncf %46 : vector<8x32xf32> to vector<8x32xbf16>
    %48 = vector.extract_strided_slice %29 {offsets = [0, 0], sizes = [32, 128], strides = [1, 1]} : vector<128x128xbf16> to vector<32x128xbf16>
    %cst_31 = arith.constant dense<0.000000e+00> : vector<8x128xf32>
    %49 = tpu.matmul %47, %48, %cst_31 {dimension_numbers = #tpu.dot_dimension_numbers<[1], [0], [0], [1], [0, 0, 1, 1], [], []>} : vector<8x32xbf16>, vector<32x128xbf16>, vector<8x128xf32> -> vector<8x128xf32>
    %50 = vector.extract_strided_slice %16 {offsets = [0, 32], sizes = [8, 32], strides = [1, 1]} : vector<8x128xbf16> to vector<8x32xbf16>
    %51 = vector.extract_strided_slice %22 {offsets = [0, 32], sizes = [8, 32], strides = [1, 1]} : vector<8x128xbf16> to vector<8x32xbf16>
    %52 = vector.extract_strided_slice %28 {offsets = [0, 32], sizes = [8, 32], strides = [1, 1]} : vector<8x128xbf16> to vector<8x32xbf16>
    %cst_32 = arith.constant dense<0.000000e+00> : vector<8x8xf32>
    %53 = tpu.matmul %50, %51, %cst_32 {dimension_numbers = #tpu.dot_dimension_numbers<[1], [1], [0], [0], [0, 0, 1, 0], [], []>} : vector<8x32xbf16>, vector<8x32xbf16>, vector<8x8xf32> -> vector<8x8xf32>
    %cst_33 = arith.constant dense<0xFF800000> : vector<8xf32>
    %54 = vector.multi_reduction <maximumf>, %53, %cst_33 [1] : vector<8x8xf32> to vector<8xf32>
    %55 = vector.shape_cast %54 : vector<8xf32> to vector<8x1xf32>
    %56 = vector.broadcast %55 : vector<8x1xf32> to vector<8x8xf32>
    %57 = arith.subf %53, %56 : vector<8x8xf32>
    %58 = math.exp %57 : vector<8x8xf32>
    %cst_34 = arith.constant dense<0.000000e+00> : vector<8xf32>
    %59 = vector.multi_reduction <add>, %58, %cst_34 [1] : vector<8x8xf32> to vector<8xf32>
    %60 = vector.shape_cast %59 : vector<8xf32> to vector<8x1xf32>
    %61 = tpu.reciprocal %60 {approx = true} : vector<8x1xf32> -> vector<8x1xf32>
    %62 = vector.broadcast %61 : vector<8x1xf32> to vector<8x8xf32>
    %63 = arith.mulf %58, %62 : vector<8x8xf32>
    %64 = arith.truncf %63 : vector<8x8xf32> to vector<8x8xbf16>
    %cst_35 = arith.constant dense<0.000000e+00> : vector<8x32xf32>
    %65 = tpu.matmul %64, %52, %cst_35 {dimension_numbers = #tpu.dot_dimension_numbers<[1], [0], [0], [1], [0, 0, 1, 1], [], []>} : vector<8x8xbf16>, vector<8x32xbf16>, vector<8x32xf32> -> vector<8x32xf32>
    %66 = arith.truncf %65 : vector<8x32xf32> to vector<8x32xbf16>
    %67 = vector.extract_strided_slice %29 {offsets = [32, 0], sizes = [32, 128], strides = [1, 1]} : vector<128x128xbf16> to vector<32x128xbf16>
    %cst_36 = arith.constant dense<0.000000e+00> : vector<8x128xf32>
    %68 = tpu.matmul %66, %67, %cst_36 {dimension_numbers = #tpu.dot_dimension_numbers<[1], [0], [0], [1], [0, 0, 1, 1], [], []>} : vector<8x32xbf16>, vector<32x128xbf16>, vector<8x128xf32> -> vector<8x128xf32>
    %69 = arith.addf %49, %68 : vector<8x128xf32>
    %70 = vector.extract_strided_slice %16 {offsets = [0, 64], sizes = [8, 32], strides = [1, 1]} : vector<8x128xbf16> to vector<8x32xbf16>
    %71 = vector.extract_strided_slice %22 {offsets = [0, 64], sizes = [8, 32], strides = [1, 1]} : vector<8x128xbf16> to vector<8x32xbf16>
    %72 = vector.extract_strided_slice %28 {offsets = [0, 64], sizes = [8, 32], strides = [1, 1]} : vector<8x128xbf16> to vector<8x32xbf16>
    %cst_37 = arith.constant dense<0.000000e+00> : vector<8x8xf32>
    %73 = tpu.matmul %70, %71, %cst_37 {dimension_numbers = #tpu.dot_dimension_numbers<[1], [1], [0], [0], [0, 0, 1, 0], [], []>} : vector<8x32xbf16>, vector<8x32xbf16>, vector<8x8xf32> -> vector<8x8xf32>
    %cst_38 = arith.constant dense<0xFF800000> : vector<8xf32>
    %74 = vector.multi_reduction <maximumf>, %73, %cst_38 [1] : vector<8x8xf32> to vector<8xf32>
    %75 = vector.shape_cast %74 : vector<8xf32> to vector<8x1xf32>
    %76 = vector.broadcast %75 : vector<8x1xf32> to vector<8x8xf32>
    %77 = arith.subf %73, %76 : vector<8x8xf32>
    %78 = math.exp %77 : vector<8x8xf32>
    %cst_39 = arith.constant dense<0.000000e+00> : vector<8xf32>
    %79 = vector.multi_reduction <add>, %78, %cst_39 [1] : vector<8x8xf32> to vector<8xf32>
    %80 = vector.shape_cast %79 : vector<8xf32> to vector<8x1xf32>
    %81 = tpu.reciprocal %80 {approx = true} : vector<8x1xf32> -> vector<8x1xf32>
    %82 = vector.broadcast %81 : vector<8x1xf32> to vector<8x8xf32>
    %83 = arith.mulf %78, %82 : vector<8x8xf32>
    %84 = arith.truncf %83 : vector<8x8xf32> to vector<8x8xbf16>
    %cst_40 = arith.constant dense<0.000000e+00> : vector<8x32xf32>
    %85 = tpu.matmul %84, %72, %cst_40 {dimension_numbers = #tpu.dot_dimension_numbers<[1], [0], [0], [1], [0, 0, 1, 1], [], []>} : vector<8x8xbf16>, vector<8x32xbf16>, vector<8x32xf32> -> vector<8x32xf32>
    %86 = arith.truncf %85 : vector<8x32xf32> to vector<8x32xbf16>
    %87 = vector.extract_strided_slice %29 {offsets = [64, 0], sizes = [32, 128], strides = [1, 1]} : vector<128x128xbf16> to vector<32x128xbf16>
    %cst_41 = arith.constant dense<0.000000e+00> : vector<8x128xf32>
    %88 = tpu.matmul %86, %87, %cst_41 {dimension_numbers = #tpu.dot_dimension_numbers<[1], [0], [0], [1], [0, 0, 1, 1], [], []>} : vector<8x32xbf16>, vector<32x128xbf16>, vector<8x128xf32> -> vector<8x128xf32>
    %89 = arith.addf %69, %88 : vector<8x128xf32>
    %90 = vector.extract_strided_slice %16 {offsets = [0, 96], sizes = [8, 32], strides = [1, 1]} : vector<8x128xbf16> to vector<8x32xbf16>
    %91 = vector.extract_strided_slice %22 {offsets = [0, 96], sizes = [8, 32], strides = [1, 1]} : vector<8x128xbf16> to vector<8x32xbf16>
    %92 = vector.extract_strided_slice %28 {offsets = [0, 96], sizes = [8, 32], strides = [1, 1]} : vector<8x128xbf16> to vector<8x32xbf16>
    %cst_42 = arith.constant dense<0.000000e+00> : vector<8x8xf32>
    %93 = tpu.matmul %90, %91, %cst_42 {dimension_numbers = #tpu.dot_dimension_numbers<[1], [1], [0], [0], [0, 0, 1, 0], [], []>} : vector<8x32xbf16>, vector<8x32xbf16>, vector<8x8xf32> -> vector<8x8xf32>
    %cst_43 = arith.constant dense<0xFF800000> : vector<8xf32>
    %94 = vector.multi_reduction <maximumf>, %93, %cst_43 [1] : vector<8x8xf32> to vector<8xf32>
    %95 = vector.shape_cast %94 : vector<8xf32> to vector<8x1xf32>
    %96 = vector.broadcast %95 : vector<8x1xf32> to vector<8x8xf32>
    %97 = arith.subf %93, %96 : vector<8x8xf32>
    %98 = math.exp %97 : vector<8x8xf32>
    %cst_44 = arith.constant dense<0.000000e+00> : vector<8xf32>
    %99 = vector.multi_reduction <add>, %98, %cst_44 [1] : vector<8x8xf32> to vector<8xf32>
    %100 = vector.shape_cast %99 : vector<8xf32> to vector<8x1xf32>
    %101 = tpu.reciprocal %100 {approx = true} : vector<8x1xf32> -> vector<8x1xf32>
    %102 = vector.broadcast %101 : vector<8x1xf32> to vector<8x8xf32>
    %103 = arith.mulf %98, %102 : vector<8x8xf32>
    %104 = arith.truncf %103 : vector<8x8xf32> to vector<8x8xbf16>
    %cst_45 = arith.constant dense<0.000000e+00> : vector<8x32xf32>
    %105 = tpu.matmul %104, %92, %cst_45 {dimension_numbers = #tpu.dot_dimension_numbers<[1], [0], [0], [1], [0, 0, 1, 1], [], []>} : vector<8x8xbf16>, vector<8x32xbf16>, vector<8x32xf32> -> vector<8x32xf32>
    %106 = arith.truncf %105 : vector<8x32xf32> to vector<8x32xbf16>
    %107 = vector.extract_strided_slice %29 {offsets = [96, 0], sizes = [32, 128], strides = [1, 1]} : vector<128x128xbf16> to vector<32x128xbf16>
    %cst_46 = arith.constant dense<0.000000e+00> : vector<8x128xf32>
    %108 = tpu.matmul %106, %107, %cst_46 {dimension_numbers = #tpu.dot_dimension_numbers<[1], [0], [0], [1], [0, 0, 1, 1], [], []>} : vector<8x32xbf16>, vector<32x128xbf16>, vector<8x128xf32> -> vector<8x128xf32>
    %109 = arith.addf %89, %108 : vector<8x128xf32>
    %110 = vector.broadcast %30 : vector<1x128xf32> to vector<8x128xf32>
    %111 = arith.addf %109, %110 : vector<8x128xf32>
    %c0_47 = arith.constant 0 : index
    %c0_48 = arith.constant 0 : index
    %c0_49 = arith.constant 0 : index
    %112 = vector.load %arg12[%c0_47, %c0_48, %c0_49] : memref<1x8x128xf32, #tpu.memory_space<vmem>>, vector<1x8x128xf32>
    %113 = vector.shape_cast %112 : vector<1x8x128xf32> to vector<8x128xf32>
    %114 = vector.shape_cast %111 : vector<8x128xf32> to vector<1x8x128xf32>
    tpu.vector_store %arg12[%c0_47, %c0_48, %c0_49], %114 {strides = array<i32>} : memref<1x8x128xf32, #tpu.memory_space<vmem>>, vector<1x8x128xf32>,
    return
  }
  func.func @transform_0(%arg0: i32) -> (i32, i32, i32) {
    %c0_i32 = arith.constant 0 : i32
    %c0_i32_0 = arith.constant 0 : i32
    %c0_i32_1 = arith.constant 0 : i32
    return %arg0, %c0_i32, %c0_i32_0 : i32, i32, i32
  }
  func.func @transform_1(%arg0: i32) -> (i32, i32, i32) {
    %c0_i32 = arith.constant 0 : i32
    %c0_i32_0 = arith.constant 0 : i32
    %c0_i32_1 = arith.constant 0 : i32
    return %arg0, %c0_i32, %c0_i32_0 : i32, i32, i32
  }
  func.func @transform_2(%arg0: i32) -> (i32, i32, i32) {
    %c0_i32 = arith.constant 0 : i32
    %c0_i32_0 = arith.constant 0 : i32
    %c0_i32_1 = arith.constant 0 : i32
    return %arg0, %c0_i32, %c0_i32_0 : i32, i32, i32
  }
  func.func @transform_3(%arg0: i32) -> (i32, i32) {
    %c0_i32 = arith.constant 0 : i32
    %c0_i32_0 = arith.constant 0 : i32
    %c0_i32_1 = arith.constant 0 : i32
    return %c0_i32, %c0_i32_0 : i32, i32
  }
  func.func @transform_4(%arg0: i32) -> (i32, i32) {
    %c0_i32 = arith.constant 0 : i32
    %c0_i32_0 = arith.constant 0 : i32
    %c0_i32_1 = arith.constant 0 : i32
    return %c0_i32, %c0_i32_0 : i32, i32
  }
  func.func @transform_5(%arg0: i32) -> (i32, i32) {
    %c0_i32 = arith.constant 0 : i32
    %c0_i32_0 = arith.constant 0 : i32
    %c0_i32_1 = arith.constant 0 : i32
    return %c0_i32, %c0_i32_0 : i32, i32
  }
  func.func @transform_6(%arg0: i32) -> (i32, i32) {
    %c0_i32 = arith.constant 0 : i32
    %c0_i32_0 = arith.constant 0 : i32
    %c0_i32_1 = arith.constant 0 : i32
    return %c0_i32, %c0_i32_0 : i32, i32
  }
  func.func @transform_7(%arg0: i32) -> (i32, i32) {
    %c0_i32 = arith.constant 0 : i32
    %c0_i32_0 = arith.constant 0 : i32
    %c0_i32_1 = arith.constant 0 : i32
    return %c0_i32, %c0_i32_0 : i32, i32
  }
  func.func @transform_8(%arg0: i32) -> (i32, i32) {
    %c0_i32 = arith.constant 0 : i32
    %c0_i32_0 = arith.constant 0 : i32
    %c0_i32_1 = arith.constant 0 : i32
    return %c0_i32, %c0_i32_0 : i32, i32
  }
  func.func @transform_9(%arg0: i32) -> (i32, i32) {
    %c0_i32 = arith.constant 0 : i32
    %c0_i32_0 = arith.constant 0 : i32
    %c0_i32_1 = arith.constant 0 : i32
    return %c0_i32, %c0_i32_0 : i32, i32
  }
  func.func @transform_10(%arg0: i32) -> (i32, i32) {
    %c0_i32 = arith.constant 0 : i32
    %c0_i32_0 = arith.constant 0 : i32
    %c0_i32_1 = arith.constant 0 : i32
    return %c0_i32, %c0_i32_0 : i32, i32
  }
  func.func @transform_11(%arg0: i32) -> (i32, i32, i32) {
    %c0_i32 = arith.constant 0 : i32
    %c0_i32_0 = arith.constant 0 : i32
    %c0_i32_1 = arith.constant 0 : i32
    return %arg0, %c0_i32, %c0_i32_0 : i32, i32, i32
  }
}

</mosaic_0001>

<bundles_post_ra>
// kernel: tpu_custom_call.1
= control target key start
LH: loop header
LB: loop body
LE: loop exit
PB: predicated region body
PF: predicated region fallthrough
CT: control target
= control target key end

     0   :  { %s2926_s0 = inlined_call_operand.hbm [shape: f32[2,8,128], index: 0, kind: input, shape index: {}]   ;;  %s2927_s1 = inlined_call_operand.hbm [shape: f32[2,8,128], index: 1, kind: input, shape index: {}]   ;;  %s2928_s2 = inlined_call_operand.hbm [shape: f32[2,8,128], index: 2, kind: input, shape index: {}]   ;;  %s2929_s3 = inlined_call_operand.hbm [shape: bf16[128,128], index: 3, kind: input, shape index: {}]   ;;  %s2930_s4 = inlined_call_operand.vmem [shape: f32[1,128], index: 4, kind: input, shape index: {}]   ;;  %s2931_s5 = inlined_call_operand.hbm [shape: bf16[128,128], index: 5, kind: input, shape index: {}]   ;;  %s2932_s6 = inlined_call_operand.vmem [shape: f32[1,128], index: 6, kind: input, shape index: {}]   ;;  %s2933_s7 = inlined_call_operand.hbm [shape: bf16[128,128], index: 7, kind: input, shape index: {}]   ;;  %s2934_s8 = inlined_call_operand.vmem [shape: f32[1,128], index: 8, kind: input, shape index: {}]   ;;  %s2935_s9 = inlined_call_operand.hbm [shape: bf16[128,128], index: 9, kind: input, shape index: {}]   ;;  %s2936_s10 = inlined_call_operand.vmem [shape: f32[1,128], index: 10, kind: input, shape index: {}]   ;;  %s2937_s11 = inlined_call_operand.hbm [shape: f32[2,8,128], index: 11, kind: output, shape index: {}]  }
   0x1   :  { %2960 = sst [smem:[#allocation26_spill]] %s2926_s0 }
   0x2   :  { %2961 = sst [smem:[#allocation27_spill]] %s2927_s1 }
   0x3   :  { %2962 = sst [smem:[#allocation28_spill]] %s2929_s3 }
   0x4   :  { %2963 = sst [smem:[#allocation29_spill]] %s2933_s7 }
   0x5   :  { %2964 = sst [smem:[#allocation30_spill]] %s2937_s11 }
   0x6   :  { %16 = vsyncpa [#allocation3], 0 }
   0x7   :  { %18 = vsyncpa [#allocation3 + $0x1], 0 }
   0x8   :  { %19 = vsyncpa [#allocation6], 0 }
   0x9   :  { %21 = vsyncpa [#allocation6 + $0x1], 0 }
   0xa   :  { %22 = vsyncpa [#allocation9], 0 }
   0xb   :  { %23 = vsyncpa [#allocation12], 0 }
   0xc   :  { %24 = vsyncpa [#allocation4], 0 }
   0xd   :  { %26 = vsyncpa [#allocation4 + $0x1], 0  ;;  %s2493_s17 = smov 0   ;;  %s2495_s18 = smov 0  }
   0xe   :  { %s2497_s19 = smov 0   ;;  %s2499_s20 = smov 0  }
   0xf LB: > { %2965 = sst [smem:[#allocation20_spill]] %s2404_s17  ;;  %s2418_s21 = smov [#allocation8]   ;;  %s2416_s20 = sphi %s2499_s20, %s3003_s20   ;;  %s2412_s19 = sphi %s2497_s19, %s3007_s19   ;;  %s2408_s18 = sphi %s2495_s18, %s3006_s18   ;;  %s2404_s17 = sphi %s2493_s17, %s3005_s17  }
  0x10   : > { %2966 = sst [smem:[#allocation21_spill]] %s2416_s20  ;;  %s321_s22 = sshll.u32 %s2418_s21, 4  ;;  %s322_s22 = int_to_ptr.vmem [resolvable:$true] %s321_s22 }
  0x11   : > { %s2514_s23 = sadd.s32 4294967295, %s2416_s20   ;;  %p1732_p0 = scmp.ge.s32.totalorder %s2416_s20, 1 }
  0x12   : > { %p2952_p1 = scmp.eq.s32.totalorder %s2514_s23, 0  ;;  %p309_p2 = scmp.lt.s32.totalorder %s2416_s20, 3 }
  0x13   : > { %s2419_s25 = smov [#allocation11]   ;;  %s2163_s28 = scalar_lea.vmem %s322_s22, 1024 }
  0x14   : > { %p2519_p3 = pnand %p1732_p0, %p309_p2  ;;  %s353_s26 = sshll.u32 %s2419_s25, 4  ;;  %s354_s26 = int_to_ptr.vmem [resolvable:$true] %s353_s26 }
  0x15   : > { %p2164_p8 = scmp.ne.s32.totalorder %s322_s22, %s2163_s28  ;;  %p2171_p11 = scmp.lt.s32.totalorder %s322_s22, %s322_s22 }
  0x16   : > { %s2967_s24 = scalar_select %p2519_p3, 1, 0 }
  0x17   : > { %p2024_p5 = pneg %p2519_p3  ;;  %p2172_p12 = scmp.lt.s32.totalorder %s2163_s28, %s2163_s28 }
  0x19   : > { %p2528_p6 = pnand %p2024_p5, %p2952_p1  ;;  %p2173_p13 = por %p2172_p12, %p2171_p11 }
  0x1b   : > { %s2968_s27 = scalar_select %p2528_p6, 1, 0 }
  0x1c   : > { %p2938_p7 = pneg %p2528_p6 }
  0x1e   : > { %p2166_p9 = pnand %p2164_p8, %p2938_p7 }
  0x20   : > { %p2167_p10 = pneg %p2166_p9 }
  0x22   : > { %p2174_p0 = pnand %p2173_p13, %p2167_p10 }
  0x24   : > { %2177 = shalt.err (!%p2174_p0)
}
  0x25   : > { %s2939_s29 = smov 64   ;;  %s2941_s30 = smov 4  }
  0x26   : > { %s2969_s3 = sld [smem:[#allocation28_spill]]  ;;  %s2189_s14 = scalar_lea.vmem %s354_s26, 1024 }
  0x27   : > { %p2190_p2 = scmp.ne.s32.totalorder %s354_s26, %s2189_s14  ;;  %p2197_p9 = scmp.lt.s32.totalorder %s354_s26, %s354_s26 }
  0x28   : > { %p2198_p10 = scmp.lt.s32.totalorder %s2189_s14, %s2189_s14 }
  0x29   : > { %p2192_p5 = pnand %p2190_p2, %p2938_p7 }
  0x2a   : > { %p2199_p11 = por %p2198_p10, %p2197_p9 }
  0x2b   : > { %p2193_p8 = pneg %p2192_p5 }
  0x2c   : > { %2027 = dma.hbm_to_vmem [thread:$0]  (!%p2528_p6), %s2969_s3, 1024, %s322_s22, [#allocation9], %s2939_s29, %s2939_s29, %s2941_s30  }
  0x2d   : > { %p2200_p12 = pnand %p2199_p11, %p2193_p8 }
  0x2f   : > { %2203 = shalt.err (!%p2200_p12)
}
  0x30   : > { %s2970_s7 = sld [smem:[#allocation29_spill]]  ;;  %s1731_s21 = sadd.s32 4294967294, %s2416_s20  }
  0x31   : > { %s2558_s22 = sadd.s32 1, %s2416_s20   ;;  %s39_s28 = sadd.s32 1, %s2412_s19 }
  0x32   : > { %2971 = sst [smem:[#allocation22_spill]] %s2558_s22  ;;  %s36_s25 = ssub.s32 %s2416_s20, %s2558_s22 }
  0x33   : > { %p37_p13 = scmp.eq.s32.totalorder %s36_s25, 0  ;;  %p46_p0 = scmp.ne.s32.totalorder %s2412_s19, %s2408_s18 }
  0x34   : > { %p47_p2 = scmp.eq.s32.totalorder %s2416_s20, 0  ;;  %p52_p5 = scmp.ne.s32.totalorder %s2408_s18, %s2404_s17 }
  0x35   : > { %s2569_s12 = scalar_select %p37_p13, %s2412_s19, %s39_s28  }
  0x36   : > { %2033 = dma.hbm_to_vmem [thread:$0]  (!%p2528_p6), %s2970_s7, 1024, %s354_s26, [#allocation12], %s2939_s29, %s2939_s29, %s2941_s30  }
  0x37   : > { %2972 = sst [smem:[#allocation23_spill]] %s2569_s12  ;;  %p48_p8 = por %p47_p2, %p46_p0 }
  0x38   : > { %p2573_p9 = por %p2952_p1, %p52_p5  ;;  %p296_p10 = scmp.eq.s32.totalorder %s2514_s23, 1 }
  0x39   : > { %p302_p11 = scmp.eq.s32.totalorder %s1731_s21, 1  ;;  %p2055_p12 = scmp.lt.s32.totalorder %s2416_s20, 2 }
  0x3a   : > { %s2973_s13 = scalar_select %p2573_p9, 1, 0 }
  0x3b   : > { %s2943_s26 = sand.u32 1, %s2412_s19   ;;  %p2580_p4 = por %p296_p10, %p46_p0 }
  0x3c   : > { %p2584_p7 = por %p302_p11, %p52_p5  ;;  %s2590_s16 = sshll.u32 %s2943_s26, 3 }
  0x3d   : > { %s2974_s14 = scalar_select %p2580_p4, 1, 0 }
  0x3e   : > { %s2976_s15 = scalar_select %p2584_p7, 1, 0 }
  0x3f   : > { %2975 = sst [smem:[#allocation24_spill]] %s2974_s14  ;;  %s2593_s25 = sshll.u32 %s2416_s20, 7 }
  0x40   : > { %2977 = sst [smem:[#allocation25_spill]] %s2976_s15  ;;  %p2595_p13 = pnand %p2055_p12, %p48_p8 }
  0x41   : > { %s404_s21 = sand.u32 1, %s2416_s20   ;;  %s2979_s1 = sld [smem:[#allocation27_spill]] }
  0x42   : > { %s408_s26 = scalar_lea.vmem [#allocation5], %s2590_s16  ;;  %s2422_s12 = smov [#allocation10]  }
  0x43   : > { %s415_s7 = sshll.u32 %s408_s26, 4  ;;  %s337_s22 = sshll.u32 %s2422_s12, 4  ;;  %s2607_s7 = int_to_ptr.vmem [resolvable:$true] %s415_s7  ;;  %s338_s22 = int_to_ptr.vmem [resolvable:$true] %s337_s22 }
  0x44   : > { %s2609_s15 = scalar_lea.sflag [#allocation6], %s404_s21  ;;  %p2615_p2 = pneg %p2595_p13 }
  0x46   : > { %s2980_s20 = scalar_select %p2615_p2, 1, 0 }
  0x47   : > { %s2604_s3 = scalar_lea.hbm %s2979_s1, %s2593_s25  ;;  %s2209_s26 = scalar_lea.hbm %s2979_s1, 256 }
  0x48   : > { %s2204_s17 = scalar_lea.hbm %s2604_s3, 128  ;;  %p2210_p10 = scmp.lt.s32.totalorder %s2604_s3, %s2979_s1 }
  0x49   : > { %p2205_p0 = scmp.ne.s32.totalorder %s2604_s3, %s2204_s17  ;;  %p2211_p11 = scmp.lt.s32.totalorder %s2209_s26, %s2204_s17 }
  0x4b   : > { %p2207_p5 = pnand %p2615_p2, %p2205_p0  ;;  %p2212_p12 = por %p2211_p11, %p2210_p10 }
  0x4d   : > { %p2208_p8 = pneg %p2207_p5 }
  0x4f   : > { %p2213_p1 = pnand %p2212_p12, %p2208_p8 }
  0x51   : > { %2216 = shalt.err (!%p2213_p1)
}
  0x52   : > { %s2217_s12 = scalar_lea.vmem %s2607_s7, 128  ;;  %s2423_s21 = smov [#allocation5]  }
  0x53   : > { %p2218_p7 = scmp.ne.s32.totalorder %s2607_s7, %s2217_s12  ;;  %s2222_s29 = sshll.u32 %s2423_s21, 4  ;;  %s2223_s29 = int_to_ptr.vmem [resolvable:$false] %s2222_s29 }
  0x54   : > { %s2224_s30 = scalar_lea.vmem %s2223_s29, 256  ;;  %p2225_p4 = scmp.lt.s32.totalorder %s2607_s7, %s2223_s29 }
  0x55   : > { %p2220_p0 = pnand %p2218_p7, %p2615_p2  ;;  %p2226_p9 = scmp.lt.s32.totalorder %s2224_s30, %s2217_s12 }
  0x57   : > { %p2221_p5 = pneg %p2220_p0  ;;  %p2227_p3 = por %p2226_p9, %p2225_p4 }
  0x59   : > { %p2228_p6 = pnand %p2227_p3, %p2221_p5 }
  0x5b   : > { %2231 = shalt.err (!%p2228_p6)
}
  0x5c   : > { %2043 = dma.hbm_to_vmem [thread:$0]  (!%p2595_p13), %s2604_s3, 128, %s2607_s7, %s2609_s15  }
  0x5d   : > { %s2243_s11 = scalar_lea.vmem %s338_s22, 1024  ;;  %p2981_p7 = scmp.ne.s32.totalorder %s2968_s27, 0 }
  0x5e   : > { %p2244_p1 = scmp.ne.s32.totalorder %s338_s22, %s2243_s11  ;;  %p2251_p12 = scmp.lt.s32.totalorder %s338_s22, %s338_s22 }
  0x5f   : > { %p2982_p8 = pneg %p2981_p7  ;;  %p2252_p0 = scmp.lt.s32.totalorder %s2243_s11, %s2243_s11 }
  0x61   : > { %p2246_p10 = pnand %p2244_p1, %p2982_p8  ;;  %p2253_p2 = por %p2252_p0, %p2251_p12 }
  0x63   : > { %p2247_p11 = pneg %p2246_p10 }
  0x65   : > { %p2254_p4 = pnand %p2253_p2, %p2247_p11 }
  0x67   : > { %2257 = shalt.err (!%p2254_p4)
}
  0x68   : > { %s2983_s17 = smov 4   ;;  %s2984_s14 = smov 64  }
  0x69   : > { %2030 = dma.hbm_to_vmem [thread:$0]  (!%p2981_p7), %s2931_s5, 1024, %s338_s22, [#allocation9], %s2984_s14, %s2984_s14, %s2983_s17  }
  0x6a   : > { %s2424_s3 = smov [#allocation13]   ;;  %p2985_p6 = pmov %p2982_p8 }
  0x6b   : > { %s369_s7 = sshll.u32 %s2424_s3, 4  ;;  %s370_s7 = int_to_ptr.vmem [resolvable:$true] %s369_s7 }
  0x6c   : > { %s2269_s21 = scalar_lea.vmem %s370_s7, 1024  ;;  %p2277_p5 = scmp.lt.s32.totalorder %s370_s7, %s370_s7 }
  0x6d   : > { %p2270_p3 = scmp.ne.s32.totalorder %s370_s7, %s2269_s21  ;;  %p2278_p1 = scmp.lt.s32.totalorder %s2269_s21, %s2269_s21 }
  0x6f   : > { %p2272_p9 = pnand %p2270_p3, %p2985_p6  ;;  %p2279_p8 = por %p2278_p1, %p2277_p5 }
  0x71   : > { %p2273_p2 = pneg %p2272_p9 }
  0x73   : > { %p2280_p10 = pnand %p2279_p8, %p2273_p2 }
  0x75   : > { %2283 = shalt.err (!%p2280_p10)
}
  0x76   : > { %2036 = dma.hbm_to_vmem [thread:$0]  (!%p2981_p7), %s2935_s9, 1024, %s370_s7, [#allocation12], %s2984_s14, %s2984_s14, %s2983_s17  }
  0x77   : > { %s2986_s0 = sld [smem:[#allocation26_spill]]  ;;  %s390_s27 = scalar_lea.vmem [#allocation2], %s2590_s16 }
  0x78   : > { %s397_s12 = sshll.u32 %s390_s27, 4  ;;  %s2987_s3 = sand.u32 1, %s2412_s19   ;;  %s398_s12 = int_to_ptr.vmem [resolvable:$true] %s397_s12 }
  0x79   : > { %s387_s21 = scalar_lea.sflag [#allocation3], %s2987_s3  ;;  %p2988_p12 = scmp.ne.s32.totalorder %s2980_s20, 0 }
  0x7d   : > { %s2664_s26 = scalar_lea.hbm %s2986_s0, %s2593_s25  ;;  %s2289_s14 = scalar_lea.hbm %s2986_s0, 256 }
  0x7e   : > { %s2284_s1 = scalar_lea.hbm %s2664_s26, 128  ;;  %p2290_p7 = scmp.lt.s32.totalorder %s2664_s26, %s2986_s0 }
  0x7f   : > { %p2285_p11 = scmp.ne.s32.totalorder %s2664_s26, %s2284_s1  ;;  %p2291_p3 = scmp.lt.s32.totalorder %s2289_s14, %s2284_s1 }
  0x81   : > { %p2287_p0 = pnand %p2285_p11, %p2988_p12  ;;  %p2292_p6 = por %p2291_p3, %p2290_p7 }
  0x83   : > { %p2288_p4 = pneg %p2287_p0 }
  0x85   : > { %p2293_p9 = pnand %p2292_p6, %p2288_p4 }
  0x87   : > { %2296 = shalt.err (!%p2293_p9)
}
  0x88   : > { %s2297_s30 = scalar_lea.vmem %s398_s12, 128  ;;  %s2425_s11 = smov [#allocation2]  }
  0x89   : > { %p2298_p2 = scmp.ne.s32.totalorder %s398_s12, %s2297_s30  ;;  %s2302_s27 = sshll.u32 %s2425_s11, 4  ;;  %s2303_s27 = int_to_ptr.vmem [resolvable:$false] %s2302_s27 }
  0x8a   : > { %s2304_s3 = scalar_lea.vmem %s2303_s27, 256  ;;  %p2305_p8 = scmp.lt.s32.totalorder %s398_s12, %s2303_s27 }
  0x8b   : > { %p2300_p5 = pnand %p2298_p2, %p2988_p12  ;;  %p2306_p10 = scmp.lt.s32.totalorder %s2304_s3, %s2297_s30 }
  0x8d   : > { %p2301_p1 = pneg %p2300_p5  ;;  %p2307_p11 = por %p2306_p10, %p2305_p8 }
  0x8f   : > { %p2308_p0 = pnand %p2307_p11, %p2301_p1 }
  0x91   : > { %2311 = shalt.err (!%p2308_p0)
}
  0x92   : > { %2040 = dma.hbm_to_vmem [thread:$0]  (!%p2595_p13), %s2664_s26, 128, %s398_s12, %s387_s21  }
  0x93   : > { %s431_s17 = scalar_lea.hbm %s2928_s2, %s2593_s25  ;;  %s426_s14 = scalar_lea.vmem [#allocation7], %s2590_s16 }
  0x94   : > { %s433_s7 = sshll.u32 %s426_s14, 4  ;;  %s2312_s29 = scalar_lea.hbm %s431_s17, 128  ;;  %s434_s7 = int_to_ptr.vmem [resolvable:$true] %s433_s7 }
  0x95   : > { %p2313_p4 = scmp.ne.s32.totalorder %s431_s17, %s2312_s29  ;;  %s2317_s27 = scalar_lea.hbm %s2928_s2, 256 }
  0x96   : > { %p2318_p6 = scmp.lt.s32.totalorder %s431_s17, %s2928_s2  ;;  %p2319_p9 = scmp.lt.s32.totalorder %s2317_s27, %s2312_s29 }
  0x97   : > { %p2315_p7 = pnand %p2313_p4, %p2988_p12 }
  0x98   : > { %p2320_p2 = por %p2319_p9, %p2318_p6 }
  0x99   : > { %p2316_p3 = pneg %p2315_p7 }
  0x9b   : > { %p2321_p5 = pnand %p2320_p2, %p2316_p3 }
  0x9d   : > { %2324 = shalt.err (!%p2321_p5)
}
  0x9e   : > { %s2325_s16 = scalar_lea.vmem %s434_s7, 128  ;;  %s2426_s25 = smov [#allocation7]  }
  0x9f   : > { %p2326_p1 = scmp.ne.s32.totalorder %s434_s7, %s2325_s16  ;;  %s2330_s26 = sshll.u32 %s2426_s25, 4  ;;  %s2331_s26 = int_to_ptr.vmem [resolvable:$false] %s2330_s26 }
  0xa0   : > { %s2332_s12 = scalar_lea.vmem %s2331_s26, 256  ;;  %p2333_p11 = scmp.lt.s32.totalorder %s434_s7, %s2331_s26 }
  0xa1   : > { %p2328_p8 = pnand %p2326_p1, %p2988_p12  ;;  %p2334_p0 = scmp.lt.s32.totalorder %s2332_s12, %s2325_s16 }
  0xa3   : > { %p2329_p10 = pneg %p2328_p8  ;;  %p2335_p4 = por %p2334_p0, %p2333_p11 }
  0xa5   : > { %p2336_p7 = pnand %p2335_p4, %p2329_p10 }
  0xa7   : > { %2339 = shalt.err (!%p2336_p7)
}
  0xa8   : > { %2046 = dma.hbm_to_vmem [thread:$0]  (!%p2595_p13), %s431_s17, 128, %s434_s7, %s2609_s15  }
  0xa9   : > { %p2989_p3 = scmp.ne.s32.totalorder %s2967_s24, 0 }
  0xaa   : > { %s2706_s0 = sand.u32 (!%p2989_p3), 1, %s2408_s18   ;;  %p2990_p12 = scmp.ne.s32.totalorder (!%p2989_p3), %s2973_s13, 0 }
  0xab   : > { %442 = sbr.rel (%p2989_p3) target bundleno = 3079 (0xc07), region = 64  ;;  %s2709_s20 = sshll.u32 (!%p2989_p3), %s2706_s0, 3 }
  0xac   : > { %s445_s21 = scalar_lea.sflag (!%p2989_p3), [#allocation3], %s2706_s0  ;;  %s448_s1 = scalar_lea.vmem (!%p2989_p3), [#allocation2], %s2709_s20 }
  0xb0   : > { %2383 = dma.done.wait (%p2990_p12), %s445_s21, 128  }
  0xb1   : > { %2385 = vsyncadd (%p2990_p12), %s445_s21, 4294967168  ;;  %s453_s24 = sand.u32 1, %s2514_s23   ;;  %s457_s28 = scalar_lea.vmem [#allocation5], %s2709_s20 }
  0xb2   : > { %s454_s15 = scalar_lea.sflag [#allocation6], %s453_s24 }
  0xb3   : > { %2387 = dma.done.wait (%p2990_p12), %s454_s15, 256  }
  0xb4   : > { %2389 = vsyncadd (%p2990_p12), %s454_s15, 4294967040  ;;  %s466_s22 = scalar_lea.vmem [#allocation7], %s2709_s20  ;;  %p2991_p13 = scmp.eq.s32.totalorder %s2514_s23, 0 }
  0xb6   : > { %2391 = dma.done.wait (%p2991_p13), [#allocation9], 2048   ;;  %p2992_p6 = pmov %p2991_p13 }
  0xb8   : > { %2393 = vsyncadd (%p2992_p6), [#allocation9], 4294965248  ;;  %p2993_p9 = pmov %p2992_p6 }
  0xb9   : > { %p2994_p2 = pmov %p2992_p6 }
  0xba   : > { %2395 = dma.done.wait (%p2993_p9), [#allocation12], 2048  }
  0xbb   : > { %2397 = vsyncadd (%p2994_p2), [#allocation12], 4294965248  ;;  %v2427_v0 = vmov 0.0   ;;  %vm2428_vm0 = vmmov 0   ;;  %v2104_v1 = vld [vmem:[#allocation10 + $0x38] sm:$0xff]   ;;  %v2106_v3 = vld [vmem:[#allocation10 + $0x30] sm:$0xff]  }
  0xbc   : > { %1880 = vmatprep.subr.bf16.mxu1 %v2427_v0  ;;  %1860 = vmatprep.subr.bf16.mxu0 %v2427_v0  ;;  %v2105_v2 = vld [vmem:[#allocation8 + $0x38] sm:$0xff]   ;;  %v2107_v4 = vld [vmem:[#allocation8 + $0x30] sm:$0xff]   ;;  %v2108_v5 = vld [vmem:[#allocation10 + $0x28] sm:$0xff]   ;;  %vm892_vm1 = vcmask 261120   ;;  %s2429_s29 = smov 96   ;;  %vm939_vm2 = vcmask 64512  }
  0xbd   : > { %1896 = vmatprep.mubr.msk.bf16.mxu1 %vm2428_vm0, %v2427_v0  ;;  %1876 = vmatprep.mubr.msk.bf16.mxu0 %vm2428_vm0, %v2427_v0  ;;  %v2109_v6 = vld [vmem:[#allocation8 + $0x28] sm:$0xff]   ;;  %v2110_v7 = vld [vmem:[#allocation10 + $0x20] sm:$0xff]   ;;  %v2112_v9 = vld [vmem:[#allocation10 + $0x18] sm:$0xff]   ;;  %vm955_vm3 = vcmask 1043456   ;;  %s2430_s27 = smov 64   ;;  %s2431_s3 = smov 32  }
  0xbe   : > { %1881 = vmatpush3.bf16.msra.mxu1 %v2104_v1  ;;  %1861 = vmatpush3.bf16.msra.mxu0 %v2105_v2  ;;  %v2111_v8 = vld [vmem:[#allocation8 + $0x20] sm:$0xff]   ;;  %v2113_v10 = vld [vmem:[#allocation8 + $0x18] sm:$0xff]   ;;  %v2114_v11 = vld [vmem:[#allocation10 + $0x10] sm:$0xff]   ;;  %s2995_s26 = sld [smem:[#allocation24_spill]]  ;;  %s1802_s12 = sshll.u32 %s2514_s23, 7 }
  0xbf   : > { %1882 = vmatprep.subr.bf16.mxu1 %v2427_v0  ;;  %1862 = vmatprep.subr.bf16.mxu0 %v2427_v0  ;;  %v2115_v12 = vld [vmem:[#allocation8 + $0x10] sm:$0xff]   ;;  %v2116_v13 = vld [vmem:[#allocation10 + $0x8] sm:$0xff]   ;;  %v2118_v15 = vld [vmem:[#allocation10] sm:$0xff]   ;;  %s530_s21 = scalar_lea.vmem [#allocation14], %s2709_s20  ;;  %s1567_s13 = scalar_lea.sflag [#allocation4], %s2706_s0 }
  0xc0   : > { %v2117_v14 = vld [vmem:[#allocation8 + $0x8] sm:$0xff]   ;;  %v2119_v17 = vld [vmem:[#allocation8] sm:$0xff]   ;;  %v532_v18 = vld [vmem:[%s448_s1] sm:$0xff]  ;;  %s1580_s1 = sshll.u32 %s530_s21, 4  ;;  %s2432_s20 = smov [#allocation14]   ;;  %s2885_s1 = int_to_ptr.vmem [resolvable:$true] %s1580_s1 }
  0xc1   : > { %v534_v16 = vld [vmem:[%s457_s28] sm:$0xff]  ;;  %v533_v20 = vpack.c.bf16 %v532_v18, %v532_v18  ;;  %v1762_v21 = vld [vmem:[%s2932_s6] ss:$0 sm:$0xff]  ;;  %v2120_v37 = vld [vmem:[#allocation11 + $0x38] sm:$0xff]   ;;  %s2996_s28 = sld [smem:[#allocation30_spill]]  ;;  %s2340_s23 = scalar_lea.vmem %s2885_s1, 128 }
  0xc2   : > { %1883 = vmatpush3.bf16.msra.mxu1 %v2106_v3  ;;  %1863 = vmatpush3.bf16.msra.mxu0 %v2107_v4  ;;  %v535_v19 = vpack.c.bf16 %v534_v16, %v534_v16  ;;  %v1753_v22 = vld [vmem:[%s2930_s4] ss:$0 sm:$0xff]  ;;  %v2122_v39 = vld [vmem:[#allocation11 + $0x28] sm:$0xff]   ;;  %v2123_v40 = vld [vmem:[#allocation11 + $0x20] sm:$0xff]   ;;  %p2341_p5 = scmp.ne.s32.totalorder %s2885_s1, %s2340_s23  ;;  %s2344_s17 = sshll.u32 %s2432_s20, 4  ;;  %s2345_s17 = int_to_ptr.vmem [resolvable:$false] %s2344_s17 }
  0xc3   : > { %1884 = vmatprep.subr.bf16.mxu1 %v2427_v0  ;;  %1864 = vmatprep.subr.bf16.mxu0 %v2427_v0  ;;  %v2121_v38 = vld [vmem:[#allocation11 + $0x30] sm:$0xff]   ;;  %v2124_v41 = vld [vmem:[#allocation11 + $0x18] sm:$0xff]   ;;  %v2126_v43 = vld [vmem:[#allocation11 + $0x8] sm:$0xff]   ;;  %s2346_s14 = scalar_lea.vmem %s2345_s17, 256  ;;  %p2347_p11 = scmp.lt.s32.totalorder %s2885_s1, %s2345_s17 }
  0xc4   : > { %v2125_v42 = vld [vmem:[#allocation11 + $0x10] sm:$0xff]   ;;  %v2127_v44 = vld [vmem:[#allocation11] sm:$0xff]   ;;  %p2997_p1 = scmp.ne.s32.totalorder %s2995_s26, 0  ;;  %p2348_p0 = scmp.lt.s32.totalorder %s2346_s14, %s2340_s23 }
  0xc5   : > { %v536_v45 = vld [vmem:[%s466_s22] sm:$0xff] }
  0xc6   : > { %1885 = vmatpush3.bf16.msra.mxu1 %v2108_v5  ;;  %1865 = vmatpush3.bf16.msra.mxu0 %v2109_v6  ;;  %v537_v46 = vpack.c.bf16 %v536_v45, %v536_v45  ;;  %v1771_v57 = vld [vmem:[%s2934_s8] ss:$0 sm:$0xff]  ;;  %p2342_p8 = pnand %p2341_p5, %p2997_p1  ;;  %p2349_p4 = por %p2348_p0, %p2347_p11 }
  0xc7   : > { %1886 = vmatprep.subr.bf16.mxu1 %v2427_v0  ;;  %1866 = vmatprep.subr.bf16.mxu0 %v2427_v0  ;;  %s2883_s22 = scalar_lea.hbm %s2996_s28, %s1802_s12 }
  0xc8   : > { %p2343_p10 = pneg %p2342_p8 }
  0xca   : > { %1887 = vmatpush3.bf16.msra.mxu1 %v2110_v7  ;;  %1867 = vmatpush3.bf16.msra.mxu0 %v2111_v8  ;;  %p2350_p7 = pnand %p2349_p4, %p2343_p10 }
  0xcb   : > { %1888 = vmatprep.subr.bf16.mxu1 %v2427_v0  ;;  %1868 = vmatprep.subr.bf16.mxu0 %v2427_v0 }
  0xce   : > { %1889 = vmatpush3.bf16.msra.mxu1 %v2112_v9  ;;  %1869 = vmatpush3.bf16.msra.mxu0 %v2113_v10 }
  0xcf   : > { %1890 = vmatprep.subr.bf16.mxu1 %v2427_v0  ;;  %1870 = vmatprep.subr.bf16.mxu0 %v2427_v0 }
  0xd2   : > { %1891 = vmatpush3.bf16.msra.mxu1 %v2114_v11  ;;  %1871 = vmatpush3.bf16.msra.mxu0 %v2115_v12 }
  0xd3   : > { %1892 = vmatprep.subr.bf16.mxu1 %v2427_v0  ;;  %1872 = vmatprep.subr.bf16.mxu0 %v2427_v0 }
  0xd6   : > { %1893 = vmatpush3.bf16.msra.mxu1 %v2116_v13  ;;  %1873 = vmatpush3.bf16.msra.mxu0 %v2117_v14 }
  0xd7   : > { %1894 = vmatprep.subr.bf16.mxu1 %v2427_v0  ;;  %1874 = vmatprep.subr.bf16.mxu0 %v2427_v0 }
  0xda   : > { %1895 = vmatpush3.bf16.msra.mxu1 %v2118_v15  ;;  %1875 = vmatpush3.bf16.msra.mxu0 %v2119_v17 }
  0xdb   : > { %1920 = vmatprep.subr.bf16.mxu1 %v2427_v0  ;;  %1900 = vmatprep.subr.bf16.mxu0 %v2427_v0 }
  0xdd   : > { %1897 = vmatmul.mubr.bf16.vlgmr.msra.gmra.mxu1 %v535_v19  ;;  %1877 = vmatmul.mubr.bf16.vlgmr.msra.gmra.mxu0 %v533_v20 }
  0xde   : > { %1922 = vmatprep.mubr.msk.bf16.mxu1 %vm2428_vm0, %v2427_v0  ;;  %1916 = vmatprep.mubr.msk.bf16.mxu0 %vm2428_vm0, %v2427_v0 }
  0xdf   : > { %1901 = vmatpush3.bf16.msra.mxu0 %v2120_v37 }
  0xe0   : > { %1902 = vmatprep.subr.bf16.mxu0 %v2427_v0 }
  0xe3   : > { %1903 = vmatpush3.bf16.msra.mxu0 %v2121_v38 }
  0xe4   : > { %1904 = vmatprep.subr.bf16.mxu0 %v2427_v0 }
  0xe7   : > { %1905 = vmatpush3.bf16.msra.mxu0 %v2122_v39 }
  0xe8   : > { %1906 = vmatprep.subr.bf16.mxu0 %v2427_v0 }
  0xeb   : > { %1907 = vmatpush3.bf16.msra.mxu0 %v2123_v40 }
  0xec   : > { %1908 = vmatprep.subr.bf16.mxu0 %v2427_v0 }
  0xef   : > { %1909 = vmatpush3.bf16.msra.mxu0 %v2124_v41 }
  0xf0   : > { %1910 = vmatprep.subr.bf16.mxu0 %v2427_v0 }
  0xf3   : > { %1911 = vmatpush3.bf16.msra.mxu0 %v2125_v42 }
  0xf4   : > { %1912 = vmatprep.subr.bf16.mxu0 %v2427_v0 }
  0xf7   : > { %1913 = vmatpush3.bf16.msra.mxu0 %v2126_v43 }
  0xf8   : > { %1914 = vmatprep.subr.bf16.mxu0 %v2427_v0 }
  0xfb   : > { %1915 = vmatpush3.bf16.msra.mxu0 %v2127_v44 }
  0xfc   : > { %1944 = vmatprep.subr.bf16.mxu0 %v2427_v0 }
  0xfe   : > { %1917 = vmatmul.mubr.bf16.vlgmr.msra.gmra.mxu0 %v537_v46 }
  0xff   : > { %1948 = vmatprep.mubr.msk.bf16.mxu0 %vm2428_vm0, %v2427_v0 }
 0x19d   : > { %v756_v23 = vpop.f32.mrf.mxu1  ;;  %v643_v25 = vpop.f32.mrf.mxu0 }
 0x19e   : > { %v757_v24 = vadd.f32 %v1762_v21, %v756_v23  ;;  %v644_v26 = vadd.f32 %v1753_v22, %v643_v25  ;;  %v2130_v25 = vld [vmem:[#allocation13 + $0x18] sm:$0xff]  }
 0x19f   : > { %v1898_v27 = vpop.f32.mrf.mxu1  ;;  %v1878_v29 = vpop.f32.mrf.mxu0  ;;  %1945 = vmatpush3.bf16.msra.mxu0 %v2130_v25 }
 0x1a0   : > { %v2768_v28 = vpack.c.bf16 %v757_v24, %v757_v24  ;;  %v649_v30 = vmul.f32 0.17677669, %v644_v26  ;;  %v2131_v26 = vld [vmem:[#allocation13 + $0x10] sm:$0xff]   ;;  %1946 = vmatprep.subr.bf16.mxu0 %v2427_v0 }
 0x1a1   : > { %v759_v31 = vpop.f32.mrf.mxu1  ;;  %v646_v32 = vpop.f32.mrf.mxu0 }
 0x1a2   : > { %1004 = vrot.lane.b32.xlu1 %v2768_v28, %s2429_s29  ;;  %v897_v33 = vsel %vm892_vm1, %v2768_v28, 0  ;;  %v2774_v34 = vpack.c.bf16 %v649_v30, %v649_v30  ;;  %v2128_v31 = vld [vmem:[#allocation13 + $0x8] sm:$0xff]  }
 0x1a3   : > { %v1899_v35 = vpop.f32.mrf.mxu1  ;;  %1921 = vmatpush3.bf16.xpose.msra.mxu1 %v897_v33  ;;  %v1879_v36 = vpop.f32.mrf.mxu0  ;;  %1947 = vmatpush3.bf16.msra.mxu0 %v2131_v26  ;;  %v2129_v33 = vld [vmem:[#allocation13] sm:$0xff]  }
 0x1a4   : > { %1926 = vmatprep.subr.bf16.mxu1 %v2427_v0  ;;  %1960 = vmatprep.subr.bf16.mxu0 %v2427_v0 }
 0x1a6   : > { %1001 = vrot.lane.b32.xlu1 %v2774_v34, %s2429_s29 }
 0x1aa   : > { %1923 = vmatmul.mubr.msk.bf16.vlgmr.msra.gmra.mxu1 %vm892_vm1, %v2774_v34 }
 0x1ab   : > { %1928 = vmatprep.mubr.msk.bf16.mxu1 %vm2428_vm0, %v2427_v0 }
 0x1be   : > { %v868_v58 = vpop.f32.mrf.mxu0 }
 0x1bf   : > { %v869_v59 = vadd.f32 %v1771_v57, %v868_v58 }
 0x1c0   : > { %v1918_v60 = vpop.f32.mrf.mxu0 }
 0x1c1   : > { %v2800_v61 = vpack.c.bf16 %v869_v59, %v869_v59 }
 0x1c2   : > { %v871_v62 = vpop.f32.mrf.mxu0 }
 0x1c3   : > { %v957_v63 = vsel %vm955_vm3, %v2800_v61, 0 }
 0x1c4   : > { %v1919_v1 = vpop.f32.mrf.mxu0  ;;  %1927 = vmatpush3.bf16.msra.mxu1 %v957_v63 }
 0x1c5   : > { %1932 = vmatprep.subr.bf16.mxu1 %v2427_v0 }
 0x214   : > { %v1005_v5 = vpop.permute.xlu1 %1004 }
 0x215   : > { %v1010_v7 = vsel %vm892_vm1, %v1005_v5, 0 }
 0x218   : > { %v1002_v8 = vpop.permute.xlu1 %1001 }
 0x26a   : > { %v933_v47 = vpop.f32.mrf.mxu1 }
 0x26b   : > { %v940_v48 = vsel %vm939_vm2, %v933_v47, -inf }
 0x26c   : > { %941 = vmax.xlane.f32.xlu0 %v940_v48  ;;  %v1924_v49 = vpop.f32.mrf.mxu1 }
 0x26e   : > { %v936_v50 = vpop.f32.mrf.mxu1 }
 0x270   : > { %v1925_v51 = vpop.f32.mrf.mxu1 }
 0x2f5   : > { %v942_v52 = vpop.xlane.xlu0 %941 }
 0x2f6   : > { %v943_v53 = vsub.f32 %v933_v47, %v942_v52 }
 0x2f8   : > { %v944_v54 = vmul.f32 1.442695, %v943_v53 }
 0x2fa   : > { %2136 = vpow2.f32 %v944_v54 }
 0x307   : > { %v2137_v55 = vpop.eup %2136 }
 0x308   : > { %v946_v56 = vsel %vm939_vm2, %v2137_v55, 0.0 }
 0x309   : > { %947 = vadd.xlane.f32.xlu0 %v946_v56 }
 0x392   : > { %v948_v2 = vpop.xlane.xlu0 %947 }
 0x393   : > { %2138 = vrcp.f32 %v948_v2  ;;  %v2132_v2 = vld [vmem:[#allocation13 + $0x28] sm:$0xff]  }
 0x3a0   : > { %v2139_v3 = vpop.eup %2138 }
 0x3a1   : > { %v950_v4 = vmul.f32 %v2139_v3, %v2137_v55 }
 0x3a3   : > { %v951_v6 = vpack.c.bf16 %v950_v4, %v950_v4 }
 0x3a5   : > { %1929 = vmatmul.mubr.msk.bf16.vlgmr.msra.gmra.mxu1 %vm939_vm2, %v951_v6 }
 0x3a6   : > { %1933 = vmatpush3.bf16.xpose.msra.mxu1 %v1010_v7  ;;  %1934 = vmatprep.mubr.msk.bf16.mxu1 %vm2428_vm0, %v2427_v0 }
 0x3a7   : > { %1938 = vmatprep.subr.bf16.mxu1 %v2427_v0 }
 0x3ad   : > { %1935 = vmatmul.mubr.msk.bf16.vlgmr.msra.gmra.mxu1 %vm892_vm1, %v1002_v8 }
 0x3ae   : > { %1940 = vmatprep.mubr.msk.bf16.mxu1 %vm2428_vm0, %v2427_v0 }
 0x465   : > { %v993_v9 = vpop.f32.mrf.mxu1 }
 0x466   : > { %v999_v36 = vpack.c.bf16 %v993_v9, %v993_v9 }
 0x467   : > { %v1930_v10 = vpop.f32.mrf.mxu1 }
 0x469   : > { %v996_v11 = vpop.f32.mrf.mxu1 }
 0x46b   : > { %v1931_v12 = vpop.f32.mrf.mxu1 }
 0x46d   : > { %v1046_v13 = vpop.f32.mrf.mxu1 }
 0x46e   : > { %v1052_v14 = vsel %vm939_vm2, %v1046_v13, -inf }
 0x46f   : > { %1053 = vmax.xlane.f32.xlu0 %v1052_v14  ;;  %v1936_v15 = vpop.f32.mrf.mxu1 }
 0x471   : > { %v1049_v16 = vpop.f32.mrf.mxu1 }
 0x473   : > { %v1937_v17 = vpop.f32.mrf.mxu1 }
 0x485   : > { %1065 = vrot.lane.b32.xlu0 %v2800_v61, %s2429_s29 }
 0x489   : > { %1226 = vrot.lane.b32.xlu0 %v2768_v28, %s2430_s27 }
 0x48d   : > { %1224 = vrot.lane.b32.xlu0 %v2774_v34, %s2430_s27 }
 0x4f8   : > { %v1054_v18 = vpop.xlane.xlu0 %1053 }
 0x4f9   : > { %v1055_v19 = vsub.f32 %v1046_v13, %v1054_v18 }
 0x4fb   : > { %v1056_v20 = vmul.f32 1.442695, %v1055_v19 }
 0x4fc   : > { %v1066_v21 = vpop.permute.xlu0 %1065 }
 0x4fd   : > { %2140 = vpow2.f32 %v1056_v20  ;;  %v1071_v22 = vsel %vm955_vm3, %v1066_v21, 0 }
 0x4fe   : > { %1939 = vmatpush3.bf16.msra.mxu1 %v1071_v22 }
 0x4ff   : > { %1952 = vmatprep.subr.bf16.mxu1 %v2427_v0 }
 0x500   : > { %v1227_v38 = vpop.permute.xlu0 %1226 }
 0x501   : > { %v1232_v42 = vsel %vm892_vm1, %v1227_v38, 0  ;;  %v2135_v38 = vld [vmem:[#allocation13 + $0x30] sm:$0xff]  }
 0x504   : > { %v1225_v46 = vpop.permute.xlu0 %1224 }
 0x50a   : > { %v2141_v23 = vpop.eup %2140 }
 0x50b   : > { %v1058_v24 = vsel %vm939_vm2, %v2141_v23, 0.0 }
 0x50c   : > { %1059 = vadd.xlane.f32.xlu1 %v1058_v24 }
 0x51d   : > { %1286 = vrot.lane.b32.xlu1 %v2800_v61, %s2430_s27 }
 0x595   : > { %v1060_v27 = vpop.xlane.xlu1 %1059 }
 0x596   : > { %2142 = vrcp.f32 %v1060_v27 }
 0x599   : > { %v1287_v35 = vpop.permute.xlu1 %1286 }
 0x59a   : > { %v1292_v37 = vsel %vm955_vm3, %v1287_v35, 0 }
 0x5a3   : > { %v2143_v29 = vpop.eup %2142 }
 0x5a4   : > { %v1062_v30 = vmul.f32 %v2143_v29, %v2141_v23  ;;  %v2134_v29 = vld [vmem:[#allocation13 + $0x38] sm:$0xff]  }
 0x5a6   : > { %v1063_v32 = vpack.c.bf16 %v1062_v30, %v1062_v30 }
 0x5a8   : > { %1941 = vmatmul.mubr.msk.bf16.vlgmr.msra.gmra.mxu1 %vm939_vm2, %v1063_v32 }
 0x5a9   : > { %1953 = vmatpush3.bf16.msra.mxu1 %v2128_v31  ;;  %1956 = vmatprep.mubr.msk.bf16.mxu1 %vm2428_vm0, %v2427_v0 }
 0x5aa   : > { %1954 = vmatprep.subr.bf16.mxu1 %v2427_v0 }
 0x5ad   : > { %1955 = vmatpush3.bf16.msra.mxu1 %v2129_v33 }
 0x5ae   : > { %1966 = vmatprep.subr.bf16.mxu1 %v2427_v0 }
 0x5b0   : > { %1957 = vmatmul.mubr.msk.bf16.vlgmr.msra.gmra.mxu1 %vm892_vm1, %v999_v36 }
 0x5b1   : > { %1967 = vmatpush3.bf16.msra.mxu1 %v1292_v37  ;;  %1968 = vmatprep.mubr.msk.bf16.mxu1 %vm2428_vm0, %v2427_v0 }
 0x5b2   : > { %1980 = vmatprep.subr.bf16.mxu1 %v2427_v0 }
 0x668   : > { %v1107_v39 = vpop.f32.mrf.mxu1 }
 0x669   : > { %v1113_v40 = vpack.c.bf16 %v1107_v39, %v1107_v39 }
 0x66a   : > { %v1942_v41 = vpop.f32.mrf.mxu1 }
 0x66b   : > { %1949 = vmatmul.mubr.msk.bf16.vlgmr.msra.gmra.mxu0 %vm892_vm1, %v1113_v40 }
 0x66c   : > { %1961 = vmatpush3.bf16.xpose.msra.mxu0 %v1232_v42  ;;  %v1110_v43 = vpop.f32.mrf.mxu1  ;;  %1962 = vmatprep.mubr.msk.bf16.mxu0 %vm2428_vm0, %v2427_v0 }
 0x66d   : > { %1972 = vmatprep.subr.bf16.mxu0 %v2427_v0  ;;  %v1800_v43 = vld [vmem:[%s2936_s10] ss:$0 sm:$0xff] }
 0x66e   : > { %v1943_v44 = vpop.f32.mrf.mxu1 }
 0x670   : > { %v2839_v45 = vpop.f32.mrf.mxu1 }
 0x672   : > { %v1958_v47 = vpop.f32.mrf.mxu1 }
 0x673   : > { %1963 = vmatmul.mubr.msk.bf16.vlgmr.msra.gmra.mxu0 %vm892_vm1, %v1225_v46 }
 0x674   : > { %v1221_v48 = vpop.f32.mrf.mxu1  ;;  %1976 = vmatprep.mubr.msk.bf16.mxu0 %vm2428_vm0, %v2427_v0  ;;  %1973 = vmatpush3.bf16.msra.mxu0 %v2132_v2 }
 0x675   : > { %1974 = vmatprep.subr.bf16.mxu0 %v2427_v0 }
 0x676   : > { %v1959_v49 = vpop.f32.mrf.mxu1 }
 0x72b   : > { %v2844_v50 = vpop.f32.mrf.mxu0 }
 0x72c   : > { %v1219_v26 = vadd.f32 %v2839_v45, %v2844_v50 }
 0x72d   : > { %v1950_v51 = vpop.f32.mrf.mxu0 }
 0x72f   : > { %v1166_v52 = vpop.f32.mrf.mxu0 }
 0x731   : > { %v1951_v53 = vpop.f32.mrf.mxu0 }
 0x733   : > { %v1268_v54 = vpop.f32.mrf.mxu0 }
 0x734   : > { %v1274_v55 = vsel %vm939_vm2, %v1268_v54, -inf }
 0x735   : > { %1275 = vmax.xlane.f32.xlu0 %v1274_v55  ;;  %v1964_v56 = vpop.f32.mrf.mxu0 }
 0x737   : > { %v1271_v57 = vpop.f32.mrf.mxu0 }
 0x739   : > { %v1965_v58 = vpop.f32.mrf.mxu0 }
 0x7be   : > { %v1276_v59 = vpop.xlane.xlu0 %1275 }
 0x7bf   : > { %v1277_v60 = vsub.f32 %v1268_v54, %v1276_v59 }
 0x7c1   : > { %v1278_v62 = vmul.f32 1.442695, %v1277_v60 }
 0x7c3   : > { %2144 = vpow2.f32 %v1278_v62 }
 0x7d0   : > { %v2145_v63 = vpop.eup %2144 }
 0x7d1   : > { %v1280_v1 = vsel %vm939_vm2, %v2145_v63, 0.0 }
 0x7d2   : > { %1281 = vadd.xlane.f32.xlu1 %v1280_v1 }
 0x7e3   : > { %1393 = vrot.lane.b32.xlu1 %v2768_v28, %s2431_s3 }
 0x7e7   : > { %1391 = vrot.lane.b32.xlu1 %v2774_v34, %s2431_s3  ;;  %v2133_v34 = vld [vmem:[#allocation13 + $0x20] sm:$0xff]  }
 0x7e8   : > { %1975 = vmatpush3.bf16.msra.mxu0 %v2133_v34 }
 0x7e9   : > { %1986 = vmatprep.subr.bf16.mxu0 %v2427_v0 }
 0x85b   : > { %v1282_v3 = vpop.xlane.xlu1 %1281 }
 0x85c   : > { %2146 = vrcp.f32 %v1282_v3 }
 0x85f   : > { %v1394_v6 = vpop.permute.xlu1 %1393 }
 0x860   : > { %v1399_v8 = vsel %vm892_vm1, %v1394_v6, 0 }
 0x863   : > { %v1392_v28 = vpop.permute.xlu1 %1391 }
 0x869   : > { %v2147_v4 = vpop.eup %2146 }
 0x86a   : > { %v1284_v5 = vmul.f32 %v2147_v4, %v2145_v63 }
 0x86c   : > { %v1285_v7 = vpack.c.bf16 %v1284_v5, %v1284_v5 }
 0x86e   : > { %1969 = vmatmul.mubr.msk.bf16.vlgmr.msra.gmra.mxu1 %vm939_vm2, %v1285_v7 }
 0x86f   : > { %1981 = vmatpush3.bf16.xpose.msra.mxu1 %v1399_v8  ;;  %1982 = vmatprep.mubr.msk.bf16.mxu1 %vm2428_vm0, %v2427_v0 }
 0x870   : > { %1992 = vmatprep.subr.bf16.mxu1 %v2427_v0 }
 0x876   : > { %1983 = vmatmul.mubr.msk.bf16.vlgmr.msra.gmra.mxu1 %vm892_vm1, %v1392_v28 }
 0x877   : > { %1996 = vmatprep.mubr.msk.bf16.mxu1 %vm2428_vm0, %v2427_v0  ;;  %1993 = vmatpush3.bf16.msra.mxu1 %v2134_v29 }
 0x878   : > { %1994 = vmatprep.subr.bf16.mxu1 %v2427_v0 }
 0x87b   : > { %1995 = vmatpush3.bf16.msra.mxu1 %v2135_v38 }
 0x92e   : > { %v1328_v9 = vpop.f32.mrf.mxu1 }
 0x92f   : > { %v1334_v10 = vpack.c.bf16 %v1328_v9, %v1328_v9 }
 0x930   : > { %v1970_v11 = vpop.f32.mrf.mxu1 }
 0x931   : > { %1977 = vmatmul.mubr.msk.bf16.vlgmr.msra.gmra.mxu0 %vm892_vm1, %v1334_v10 }
 0x932   : > { %v1331_v12 = vpop.f32.mrf.mxu1  ;;  %1988 = vmatprep.mubr.msk.bf16.mxu0 %vm2428_vm0, %v2427_v0 }
 0x934   : > { %v1971_v13 = vpop.f32.mrf.mxu1 }
 0x936   : > { %v1435_v14 = vpop.f32.mrf.mxu1 }
 0x937   : > { %v1441_v15 = vsel %vm939_vm2, %v1435_v14, -inf }
 0x938   : > { %1442 = vmax.xlane.f32.xlu0 %v1441_v15  ;;  %v1984_v16 = vpop.f32.mrf.mxu1 }
 0x93a   : > { %v1438_v17 = vpop.f32.mrf.mxu1 }
 0x93c   : > { %v1985_v18 = vpop.f32.mrf.mxu1 }
 0x94e   : > { %1453 = vrot.lane.b32.xlu0 %v2800_v61, %s2431_s3 }
 0x9c1   : > { %v1443_v19 = vpop.xlane.xlu0 %1442 }
 0x9c2   : > { %v1444_v20 = vsub.f32 %v1435_v14, %v1443_v19 }
 0x9c4   : > { %v1445_v21 = vmul.f32 1.442695, %v1444_v20 }
 0x9c5   : > { %v1454_v22 = vpop.permute.xlu0 %1453 }
 0x9c6   : > { %2148 = vpow2.f32 %v1445_v21  ;;  %v1459_v23 = vsel %vm955_vm3, %v1454_v22, 0 }
 0x9c7   : > { %1987 = vmatpush3.bf16.msra.mxu0 %v1459_v23 }
 0x9d3   : > { %v2149_v24 = vpop.eup %2148 }
 0x9d4   : > { %v1447_v25 = vsel %vm939_vm2, %v2149_v24, 0.0 }
 0x9d5   : > { %1448 = vadd.xlane.f32.xlu1 %v1447_v25 }
 0x9f1   : > { %v1384_v27 = vpop.f32.mrf.mxu0 }
 0x9f2   : > { %v1390_v30 = vadd.f32 %v1384_v27, %v1219_v26 }
 0x9f3   : > { %v1978_v31 = vpop.f32.mrf.mxu0 }
 0x9f5   : > { %v1387_v61 = vpop.f32.mrf.mxu0 }
 0x9f7   : > { %v1979_v32 = vpop.f32.mrf.mxu0 }
 0xa5e   : > { %v1449_v33 = vpop.xlane.xlu1 %1448 }
 0xa5f   : > { %2150 = vrcp.f32 %v1449_v33 }
 0xa6c   : > { %v2151_v35 = vpop.eup %2150 }
 0xa6d   : > { %v1451_v36 = vmul.f32 %v2151_v35, %v2149_v24 }
 0xa6f   : > { %v1452_v37 = vpack.c.bf16 %v1451_v36, %v1451_v36 }
 0xa71   : > { %1989 = vmatmul.mubr.msk.bf16.vlgmr.msra.gmra.mxu0 %vm939_vm2, %v1452_v37 }
 0xb31   : > { %v1495_v39 = vpop.f32.mrf.mxu0 }
 0xb32   : > { %v1501_v40 = vpack.c.bf16 %v1495_v39, %v1495_v39 }
 0xb33   : > { %v1990_v41 = vpop.f32.mrf.mxu0 }
 0xb34   : > { %1997 = vmatmul.mubr.msk.bf16.vlgmr.msra.gmra.mxu1 %vm892_vm1, %v1501_v40 }
 0xb35   : > { %v1498_v0 = vpop.f32.mrf.mxu0 }
 0xb37   : > { %v1991_v42 = vpop.f32.mrf.mxu0 }
 0xbf4   : > { %v1551_v44 = vpop.f32.mrf.mxu1 }
 0xbf5   : > { %v1557_v45 = vadd.f32 %v1551_v44, %v1390_v30 }
 0xbf6   : > { %v1998_v46 = vpop.f32.mrf.mxu1 }
 0xbf7   : > { %v1564_v47 = vadd.f32 %v1800_v43, %v1557_v45 }
 0xbf8   : > { %v1554_v48 = vpop.f32.mrf.mxu1 }
 0xbf9   : > { %1565 = vst [vmem:[%s530_s21] sm:$0xff] %v1564_v47 }
 0xbfa   : > { %v1999_v49 = vpop.f32.mrf.mxu1 }
 0xbfb   : > { %2353 = shalt.err (!%p2350_p7)
}
 0xbfc   : > { %s2354_s7 = scalar_lea.hbm %s2883_s22, 128  ;;  %s2358_s30 = scalar_lea.hbm %s2996_s28, 256 }
 0xbfd   : > { %p2355_p3 = scmp.ne.s32.totalorder %s2883_s22, %s2354_s7  ;;  %p2359_p6 = scmp.lt.s32.totalorder %s2883_s22, %s2996_s28 }
 0xbfe   : > { %p2360_p9 = scmp.lt.s32.totalorder %s2358_s30, %s2354_s7 }
 0xbff   : > { %p2356_p12 = pnand %p2355_p3, %p2997_p1 }
 0xc00   : > { %p2361_p2 = por %p2360_p9, %p2359_p6 }
 0xc01   : > { %p2357_p13 = pneg %p2356_p12 }
 0xc03   : > { %p2362_p5 = pnand %p2361_p2, %p2357_p13 }
 0xc05   : > { %2365 = shalt.err (!%p2362_p5)
}
 0xc06   : > { %2022 = dma.vmem_to_hbm [thread:$0]  (%p2997_p1), %s2885_s1, 128, %s2883_s22, %s1567_s13  }
 0xc07 PF: > { %s2998_s3 = sld [smem:[#allocation20_spill]] }
 0xc08   : > { %s2999_s16 = sld [smem:[#allocation25_spill]] }
 0xc09   : > { %s3000_s25 = sld [smem:[#allocation21_spill]] }
 0xc0d   : > { %s1592_s12 = sand.u32 1, %s2998_s3  }
 0xc0e   : > { %p3001_p8 = scmp.ne.s32.totalorder %s2999_s16, 0  ;;  %s1593_s21 = scalar_lea.sflag [#allocation4], %s1592_s12 }
 0xc0f   : > { %p3002_p10 = scmp.ge.s32.totalorder %s3000_s25, 2 }
 0xc11   : > { %p2048_p11 = pnand %p3002_p10, %p3001_p8 }
 0xc13   : > { %p2049_p0 = pneg %p2048_p11 }
 0xc15   : > { %2399 = dma.done.wait (%p2049_p0), %s1593_s21, 128  }
 0xc16   : > { %2401 = vsyncadd (%p2049_p0), %s1593_s21, 4294967168  ;;  %s3003_s20 = sld [smem:[#allocation22_spill]]  ;;  %s3005_s17 = smov %s2408_s18 }
 0xc17   : > { %s3004_s24 = sld [smem:[#allocation23_spill]]  ;;  %s3006_s18 = smov %s2412_s19 }
 0xc1c   : > { %p29_p4 = scmp.ge.s32.totalorder %s3003_s20, 4  }
 0xc1d   : > { %s3007_s19 = smov %s3004_s24 }
 0xc1e   :  { %31 = sbr.rel (!%p29_p4) target bundleno = 15 (0xf), region = 149 }
 0xc23   :  { %1598 = vsyncpa [#allocation3], 1 }
 0xc24   :  { %1600 = vsyncpa [#allocation3 + $0x1], 1 }
 0xc25   :  { %1601 = vsyncpa [#allocation6], 1 }
 0xc26   :  { %1603 = vsyncpa [#allocation6 + $0x1], 1 }
 0xc27   :  { %1604 = vsyncpa [#allocation9], 1 }
 0xc28   :  { %1605 = vsyncpa [#allocation12], 1 }
 0xc29   :  { %1606 = vsyncpa [#allocation4], 1 }
 0xc2a   :  { %1608 = vsyncpa [#allocation4 + $0x1], 1 }

// kernel: tpu_custom_call.1
= control target key start
LH: loop header
LB: loop body
LE: loop exit
PB: predicated region body
PF: predicated region fallthrough
CT: control target
= control target key end

     0   :  { %s2926_s0 = inlined_call_operand.hbm [shape: f32[2,8,128], index: 0, kind: input, shape index: {}]   ;;  %s2927_s1 = inlined_call_operand.hbm [shape: f32[2,8,128], index: 1, kind: input, shape index: {}]   ;;  %s2928_s2 = inlined_call_operand.hbm [shape: f32[2,8,128], index: 2, kind: input, shape index: {}]   ;;  %s2929_s3 = inlined_call_operand.hbm [shape: bf16[128,128], index: 3, kind: input, shape index: {}]   ;;  %s2930_s4 = inlined_call_operand.vmem [shape: f32[1,128], index: 4, kind: input, shape index: {}]   ;;  %s2931_s5 = inlined_call_operand.hbm [shape: bf16[128,128], index: 5, kind: input, shape index: {}]   ;;  %s2932_s6 = inlined_call_operand.vmem [shape: f32[1,128], index: 6, kind: input, shape index: {}]   ;;  %s2933_s7 = inlined_call_operand.hbm [shape: bf16[128,128], index: 7, kind: input, shape index: {}]   ;;  %s2934_s8 = inlined_call_operand.vmem [shape: f32[1,128], index: 8, kind: input, shape index: {}]   ;;  %s2935_s9 = inlined_call_operand.hbm [shape: bf16[128,128], index: 9, kind: input, shape index: {}]   ;;  %s2936_s10 = inlined_call_operand.vmem [shape: f32[1,128], index: 10, kind: input, shape index: {}]   ;;  %s2937_s11 = inlined_call_operand.hbm [shape: f32[2,8,128], index: 11, kind: output, shape index: {}]  }
   0x1   :  { %2960 = sst [smem:[#allocation26_spill]] %s2926_s0 }
   0x2   :  { %2961 = sst [smem:[#allocation27_spill]] %s2927_s1 }
   0x3   :  { %2962 = sst [smem:[#allocation28_spill]] %s2929_s3 }
   0x4   :  { %2963 = sst [smem:[#allocation29_spill]] %s2933_s7 }
   0x5   :  { %2964 = sst [smem:[#allocation30_spill]] %s2937_s11 }
   0x6   :  { %16 = vsyncpa [#allocation3], 0 }
   0x7   :  { %18 = vsyncpa [#allocation3 + $0x1], 0 }
   0x8   :  { %19 = vsyncpa [#allocation6], 0 }
   0x9   :  { %21 = vsyncpa [#allocation6 + $0x1], 0 }
   0xa   :  { %22 = vsyncpa [#allocation9], 0 }
   0xb   :  { %23 = vsyncpa [#allocation12], 0 }
   0xc   :  { %24 = vsyncpa [#allocation4], 0 }
   0xd   :  { %26 = vsyncpa [#allocation4 + $0x1], 0  ;;  %s2493_s17 = smov 0   ;;  %s2495_s18 = smov 0  }
   0xe   :  { %s2497_s19 = smov 0   ;;  %s2499_s20 = smov 0  }
   0xf LB: > { %2965 = sst [smem:[#allocation20_spill]] %s2404_s17  ;;  %s2418_s21 = smov [#allocation8]   ;;  %s2416_s20 = sphi %s2499_s20, %s3003_s20   ;;  %s2412_s19 = sphi %s2497_s19, %s3007_s19   ;;  %s2408_s18 = sphi %s2495_s18, %s3006_s18   ;;  %s2404_s17 = sphi %s2493_s17, %s3005_s17  }
  0x10   : > { %2966 = sst [smem:[#allocation21_spill]] %s2416_s20  ;;  %s321_s22 = sshll.u32 %s2418_s21, 4  ;;  %s322_s22 = int_to_ptr.vmem [resolvable:$true] %s321_s22 }
  0x11   : > { %s2514_s23 = sadd.s32 4294967295, %s2416_s20   ;;  %p1732_p0 = scmp.ge.s32.totalorder %s2416_s20, 1 }
  0x12   : > { %p2952_p1 = scmp.eq.s32.totalorder %s2514_s23, 0  ;;  %p309_p2 = scmp.lt.s32.totalorder %s2416_s20, 3 }
  0x13   : > { %s2419_s25 = smov [#allocation11]   ;;  %s2163_s28 = scalar_lea.vmem %s322_s22, 1024 }
  0x14   : > { %p2519_p3 = pnand %p1732_p0, %p309_p2  ;;  %s353_s26 = sshll.u32 %s2419_s25, 4  ;;  %s354_s26 = int_to_ptr.vmem [resolvable:$true] %s353_s26 }
  0x15   : > { %p2164_p8 = scmp.ne.s32.totalorder %s322_s22, %s2163_s28  ;;  %p2171_p11 = scmp.lt.s32.totalorder %s322_s22, %s322_s22 }
  0x16   : > { %s2967_s24 = scalar_select %p2519_p3, 1, 0 }
  0x17   : > { %p2024_p5 = pneg %p2519_p3  ;;  %p2172_p12 = scmp.lt.s32.totalorder %s2163_s28, %s2163_s28 }
  0x19   : > { %p2528_p6 = pnand %p2024_p5, %p2952_p1  ;;  %p2173_p13 = por %p2172_p12, %p2171_p11 }
  0x1b   : > { %s2968_s27 = scalar_select %p2528_p6, 1, 0 }
  0x1c   : > { %p2938_p7 = pneg %p2528_p6 }
  0x1e   : > { %p2166_p9 = pnand %p2164_p8, %p2938_p7 }
  0x20   : > { %p2167_p10 = pneg %p2166_p9 }
  0x22   : > { %p2174_p0 = pnand %p2173_p13, %p2167_p10 }
  0x24   : > { %2177 = shalt.err (!%p2174_p0)
}
  0x25   : > { %s2939_s29 = smov 64   ;;  %s2941_s30 = smov 4  }
  0x26   : > { %s2969_s3 = sld [smem:[#allocation28_spill]]  ;;  %s2189_s14 = scalar_lea.vmem %s354_s26, 1024 }
  0x27   : > { %p2190_p2 = scmp.ne.s32.totalorder %s354_s26, %s2189_s14  ;;  %p2197_p9 = scmp.lt.s32.totalorder %s354_s26, %s354_s26 }
  0x28   : > { %p2198_p10 = scmp.lt.s32.totalorder %s2189_s14, %s2189_s14 }
  0x29   : > { %p2192_p5 = pnand %p2190_p2, %p2938_p7 }
  0x2a   : > { %p2199_p11 = por %p2198_p10, %p2197_p9 }
  0x2b   : > { %p2193_p8 = pneg %p2192_p5 }
  0x2c   : > { %2027 = dma.hbm_to_vmem [thread:$0]  (!%p2528_p6), %s2969_s3, 1024, %s322_s22, [#allocation9], %s2939_s29, %s2939_s29, %s2941_s30  }
  0x2d   : > { %p2200_p12 = pnand %p2199_p11, %p2193_p8 }
  0x2f   : > { %2203 = shalt.err (!%p2200_p12)
}
  0x30   : > { %s2970_s7 = sld [smem:[#allocation29_spill]]  ;;  %s1731_s21 = sadd.s32 4294967294, %s2416_s20  }
  0x31   : > { %s2558_s22 = sadd.s32 1, %s2416_s20   ;;  %s39_s28 = sadd.s32 1, %s2412_s19 }
  0x32   : > { %2971 = sst [smem:[#allocation22_spill]] %s2558_s22  ;;  %s36_s25 = ssub.s32 %s2416_s20, %s2558_s22 }
  0x33   : > { %p37_p13 = scmp.eq.s32.totalorder %s36_s25, 0  ;;  %p46_p0 = scmp.ne.s32.totalorder %s2412_s19, %s2408_s18 }
  0x34   : > { %p47_p2 = scmp.eq.s32.totalorder %s2416_s20, 0  ;;  %p52_p5 = scmp.ne.s32.totalorder %s2408_s18, %s2404_s17 }
  0x35   : > { %s2569_s12 = scalar_select %p37_p13, %s2412_s19, %s39_s28  }
  0x36   : > { %2033 = dma.hbm_to_vmem [thread:$0]  (!%p2528_p6), %s2970_s7, 1024, %s354_s26, [#allocation12], %s2939_s29, %s2939_s29, %s2941_s30  }
  0x37   : > { %2972 = sst [smem:[#allocation23_spill]] %s2569_s12  ;;  %p48_p8 = por %p47_p2, %p46_p0 }
  0x38   : > { %p2573_p9 = por %p2952_p1, %p52_p5  ;;  %p296_p10 = scmp.eq.s32.totalorder %s2514_s23, 1 }
  0x39   : > { %p302_p11 = scmp.eq.s32.totalorder %s1731_s21, 1  ;;  %p2055_p12 = scmp.lt.s32.totalorder %s2416_s20, 2 }
  0x3a   : > { %s2973_s13 = scalar_select %p2573_p9, 1, 0 }
  0x3b   : > { %s2943_s26 = sand.u32 1, %s2412_s19   ;;  %p2580_p4 = por %p296_p10, %p46_p0 }
  0x3c   : > { %p2584_p7 = por %p302_p11, %p52_p5  ;;  %s2590_s16 = sshll.u32 %s2943_s26, 3 }
  0x3d   : > { %s2974_s14 = scalar_select %p2580_p4, 1, 0 }
  0x3e   : > { %s2976_s15 = scalar_select %p2584_p7, 1, 0 }
  0x3f   : > { %2975 = sst [smem:[#allocation24_spill]] %s2974_s14  ;;  %s2593_s25 = sshll.u32 %s2416_s20, 7 }
  0x40   : > { %2977 = sst [smem:[#allocation25_spill]] %s2976_s15  ;;  %p2595_p13 = pnand %p2055_p12, %p48_p8 }
  0x41   : > { %s404_s21 = sand.u32 1, %s2416_s20   ;;  %s2979_s1 = sld [smem:[#allocation27_spill]] }
  0x42   : > { %s408_s26 = scalar_lea.vmem [#allocation5], %s2590_s16  ;;  %s2422_s12 = smov [#allocation10]  }
  0x43   : > { %s415_s7 = sshll.u32 %s408_s26, 4  ;;  %s337_s22 = sshll.u32 %s2422_s12, 4  ;;  %s2607_s7 = int_to_ptr.vmem [resolvable:$true] %s415_s7  ;;  %s338_s22 = int_to_ptr.vmem [resolvable:$true] %s337_s22 }
  0x44   : > { %s2609_s15 = scalar_lea.sflag [#allocation6], %s404_s21  ;;  %p2615_p2 = pneg %p2595_p13 }
  0x46   : > { %s2980_s20 = scalar_select %p2615_p2, 1, 0 }
  0x47   : > { %s2604_s3 = scalar_lea.hbm %s2979_s1, %s2593_s25  ;;  %s2209_s26 = scalar_lea.hbm %s2979_s1, 256 }
  0x48   : > { %s2204_s17 = scalar_lea.hbm %s2604_s3, 128  ;;  %p2210_p10 = scmp.lt.s32.totalorder %s2604_s3, %s2979_s1 }
  0x49   : > { %p2205_p0 = scmp.ne.s32.totalorder %s2604_s3, %s2204_s17  ;;  %p2211_p11 = scmp.lt.s32.totalorder %s2209_s26, %s2204_s17 }
  0x4b   : > { %p2207_p5 = pnand %p2615_p2, %p2205_p0  ;;  %p2212_p12 = por %p2211_p11, %p2210_p10 }
  0x4d   : > { %p2208_p8 = pneg %p2207_p5 }
  0x4f   : > { %p2213_p1 = pnand %p2212_p12, %p2208_p8 }
  0x51   : > { %2216 = shalt.err (!%p2213_p1)
}
  0x52   : > { %s2217_s12 = scalar_lea.vmem %s2607_s7, 128  ;;  %s2423_s21 = smov [#allocation5]  }
  0x53   : > { %p2218_p7 = scmp.ne.s32.totalorder %s2607_s7, %s2217_s12  ;;  %s2222_s29 = sshll.u32 %s2423_s21, 4  ;;  %s2223_s29 = int_to_ptr.vmem [resolvable:$false] %s2222_s29 }
  0x54   : > { %s2224_s30 = scalar_lea.vmem %s2223_s29, 256  ;;  %p2225_p4 = scmp.lt.s32.totalorder %s2607_s7, %s2223_s29 }
  0x55   : > { %p2220_p0 = pnand %p2218_p7, %p2615_p2  ;;  %p2226_p9 = scmp.lt.s32.totalorder %s2224_s30, %s2217_s12 }
  0x57   : > { %p2221_p5 = pneg %p2220_p0  ;;  %p2227_p3 = por %p2226_p9, %p2225_p4 }
  0x59   : > { %p2228_p6 = pnand %p2227_p3, %p2221_p5 }
  0x5b   : > { %2231 = shalt.err (!%p2228_p6)
}
  0x5c   : > { %2043 = dma.hbm_to_vmem [thread:$0]  (!%p2595_p13), %s2604_s3, 128, %s2607_s7, %s2609_s15  }
  0x5d   : > { %s2243_s11 = scalar_lea.vmem %s338_s22, 1024  ;;  %p2981_p7 = scmp.ne.s32.totalorder %s2968_s27, 0 }
  0x5e   : > { %p2244_p1 = scmp.ne.s32.totalorder %s338_s22, %s2243_s11  ;;  %p2251_p12 = scmp.lt.s32.totalorder %s338_s22, %s338_s22 }
  0x5f   : > { %p2982_p8 = pneg %p2981_p7  ;;  %p2252_p0 = scmp.lt.s32.totalorder %s2243_s11, %s2243_s11 }
  0x61   : > { %p2246_p10 = pnand %p2244_p1, %p2982_p8  ;;  %p2253_p2 = por %p2252_p0, %p2251_p12 }
  0x63   : > { %p2247_p11 = pneg %p2246_p10 }
  0x65   : > { %p2254_p4 = pnand %p2253_p2, %p2247_p11 }
  0x67   : > { %2257 = shalt.err (!%p2254_p4)
}
  0x68   : > { %s2983_s17 = smov 4   ;;  %s2984_s14 = smov 64  }
  0x69   : > { %2030 = dma.hbm_to_vmem [thread:$0]  (!%p2981_p7), %s2931_s5, 1024, %s338_s22, [#allocation9], %s2984_s14, %s2984_s14, %s2983_s17  }
  0x6a   : > { %s2424_s3 = smov [#allocation13]   ;;  %p2985_p6 = pmov %p2982_p8 }
  0x6b   : > { %s369_s7 = sshll.u32 %s2424_s3, 4  ;;  %s370_s7 = int_to_ptr.vmem [resolvable:$true] %s369_s7 }
  0x6c   : > { %s2269_s21 = scalar_lea.vmem %s370_s7, 1024  ;;  %p2277_p5 = scmp.lt.s32.totalorder %s370_s7, %s370_s7 }
  0x6d   : > { %p2270_p3 = scmp.ne.s32.totalorder %s370_s7, %s2269_s21  ;;  %p2278_p1 = scmp.lt.s32.totalorder %s2269_s21, %s2269_s21 }
  0x6f   : > { %p2272_p9 = pnand %p2270_p3, %p2985_p6  ;;  %p2279_p8 = por %p2278_p1, %p2277_p5 }
  0x71   : > { %p2273_p2 = pneg %p2272_p9 }
  0x73   : > { %p2280_p10 = pnand %p2279_p8, %p2273_p2 }
  0x75   : > { %2283 = shalt.err (!%p2280_p10)
}
  0x76   : > { %2036 = dma.hbm_to_vmem [thread:$0]  (!%p2981_p7), %s2935_s9, 1024, %s370_s7, [#allocation12], %s2984_s14, %s2984_s14, %s2983_s17  }
  0x77   : > { %s2986_s0 = sld [smem:[#allocation26_spill]]  ;;  %s390_s27 = scalar_lea.vmem [#allocation2], %s2590_s16 }
  0x78   : > { %s397_s12 = sshll.u32 %s390_s27, 4  ;;  %s2987_s3 = sand.u32 1, %s2412_s19   ;;  %s398_s12 = int_to_ptr.vmem [resolvable:$true] %s397_s12 }
  0x79   : > { %s387_s21 = scalar_lea.sflag [#allocation3], %s2987_s3  ;;  %p2988_p12 = scmp.ne.s32.totalorder %s2980_s20, 0 }
  0x7d   : > { %s2664_s26 = scalar_lea.hbm %s2986_s0, %s2593_s25  ;;  %s2289_s14 = scalar_lea.hbm %s2986_s0, 256 }
  0x7e   : > { %s2284_s1 = scalar_lea.hbm %s2664_s26, 128  ;;  %p2290_p7 = scmp.lt.s32.totalorder %s2664_s26, %s2986_s0 }
  0x7f   : > { %p2285_p11 = scmp.ne.s32.totalorder %s2664_s26, %s2284_s1  ;;  %p2291_p3 = scmp.lt.s32.totalorder %s2289_s14, %s2284_s1 }
  0x81   : > { %p2287_p0 = pnand %p2285_p11, %p2988_p12  ;;  %p2292_p6 = por %p2291_p3, %p2290_p7 }
  0x83   : > { %p2288_p4 = pneg %p2287_p0 }
  0x85   : > { %p2293_p9 = pnand %p2292_p6, %p2288_p4 }
  0x87   : > { %2296 = shalt.err (!%p2293_p9)
}
  0x88   : > { %s2297_s30 = scalar_lea.vmem %s398_s12, 128  ;;  %s2425_s11 = smov [#allocation2]  }
  0x89   : > { %p2298_p2 = scmp.ne.s32.totalorder %s398_s12, %s2297_s30  ;;  %s2302_s27 = sshll.u32 %s2425_s11, 4  ;;  %s2303_s27 = int_to_ptr.vmem [resolvable:$false] %s2302_s27 }
  0x8a   : > { %s2304_s3 = scalar_lea.vmem %s2303_s27, 256  ;;  %p2305_p8 = scmp.lt.s32.totalorder %s398_s12, %s2303_s27 }
  0x8b   : > { %p2300_p5 = pnand %p2298_p2, %p2988_p12  ;;  %p2306_p10 = scmp.lt.s32.totalorder %s2304_s3, %s2297_s30 }
  0x8d   : > { %p2301_p1 = pneg %p2300_p5  ;;  %p2307_p11 = por %p2306_p10, %p2305_p8 }
  0x8f   : > { %p2308_p0 = pnand %p2307_p11, %p2301_p1 }
  0x91   : > { %2311 = shalt.err (!%p2308_p0)
}
  0x92   : > { %2040 = dma.hbm_to_vmem [thread:$0]  (!%p2595_p13), %s2664_s26, 128, %s398_s12, %s387_s21  }
  0x93   : > { %s431_s17 = scalar_lea.hbm %s2928_s2, %s2593_s25  ;;  %s426_s14 = scalar_lea.vmem [#allocation7], %s2590_s16 }
  0x94   : > { %s433_s7 = sshll.u32 %s426_s14, 4  ;;  %s2312_s29 = scalar_lea.hbm %s431_s17, 128  ;;  %s434_s7 = int_to_ptr.vmem [resolvable:$true] %s433_s7 }
  0x95   : > { %p2313_p4 = scmp.ne.s32.totalorder %s431_s17, %s2312_s29  ;;  %s2317_s27 = scalar_lea.hbm %s2928_s2, 256 }
  0x96   : > { %p2318_p6 = scmp.lt.s32.totalorder %s431_s17, %s2928_s2  ;;  %p2319_p9 = scmp.lt.s32.totalorder %s2317_s27, %s2312_s29 }
  0x97   : > { %p2315_p7 = pnand %p2313_p4, %p2988_p12 }
  0x98   : > { %p2320_p2 = por %p2319_p9, %p2318_p6 }
  0x99   : > { %p2316_p3 = pneg %p2315_p7 }
  0x9b   : > { %p2321_p5 = pnand %p2320_p2, %p2316_p3 }
  0x9d   : > { %2324 = shalt.err (!%p2321_p5)
}
  0x9e   : > { %s2325_s16 = scalar_lea.vmem %s434_s7, 128  ;;  %s2426_s25 = smov [#allocation7]  }
  0x9f   : > { %p2326_p1 = scmp.ne.s32.totalorder %s434_s7, %s2325_s16  ;;  %s2330_s26 = sshll.u32 %s2426_s25, 4  ;;  %s2331_s26 = int_to_ptr.vmem [resolvable:$false] %s2330_s26 }
  0xa0   : > { %s2332_s12 = scalar_lea.vmem %s2331_s26, 256  ;;  %p2333_p11 = scmp.lt.s32.totalorder %s434_s7, %s2331_s26 }
  0xa1   : > { %p2328_p8 = pnand %p2326_p1, %p2988_p12  ;;  %p2334_p0 = scmp.lt.s32.totalorder %s2332_s12, %s2325_s16 }
  0xa3   : > { %p2329_p10 = pneg %p2328_p8  ;;  %p2335_p4 = por %p2334_p0, %p2333_p11 }
  0xa5   : > { %p2336_p7 = pnand %p2335_p4, %p2329_p10 }
  0xa7   : > { %2339 = shalt.err (!%p2336_p7)
}
  0xa8   : > { %2046 = dma.hbm_to_vmem [thread:$0]  (!%p2595_p13), %s431_s17, 128, %s434_s7, %s2609_s15  }
  0xa9   : > { %p2989_p3 = scmp.ne.s32.totalorder %s2967_s24, 0 }
  0xaa   : > { %s2706_s0 = sand.u32 (!%p2989_p3), 1, %s2408_s18   ;;  %p2990_p12 = scmp.ne.s32.totalorder (!%p2989_p3), %s2973_s13, 0 }
  0xab   : > { %442 = sbr.rel (%p2989_p3) target bundleno = 3079 (0xc07), region = 64  ;;  %s2709_s20 = sshll.u32 (!%p2989_p3), %s2706_s0, 3 }
  0xac   : > { %s445_s21 = scalar_lea.sflag (!%p2989_p3), [#allocation3], %s2706_s0  ;;  %s448_s1 = scalar_lea.vmem (!%p2989_p3), [#allocation2], %s2709_s20 }
  0xb0   : > { %2383 = dma.done.wait (%p2990_p12), %s445_s21, 128  }
  0xb1   : > { %2385 = vsyncadd (%p2990_p12), %s445_s21, 4294967168  ;;  %s453_s24 = sand.u32 1, %s2514_s23   ;;  %s457_s28 = scalar_lea.vmem [#allocation5], %s2709_s20 }
  0xb2   : > { %s454_s15 = scalar_lea.sflag [#allocation6], %s453_s24 }
  0xb3   : > { %2387 = dma.done.wait (%p2990_p12), %s454_s15, 256  }
  0xb4   : > { %2389 = vsyncadd (%p2990_p12), %s454_s15, 4294967040  ;;  %s466_s22 = scalar_lea.vmem [#allocation7], %s2709_s20  ;;  %p2991_p13 = scmp.eq.s32.totalorder %s2514_s23, 0 }
  0xb6   : > { %2391 = dma.done.wait (%p2991_p13), [#allocation9], 2048   ;;  %p2992_p6 = pmov %p2991_p13 }
  0xb8   : > { %2393 = vsyncadd (%p2992_p6), [#allocation9], 4294965248  ;;  %p2993_p9 = pmov %p2992_p6 }
  0xb9   : > { %p2994_p2 = pmov %p2992_p6 }
  0xba   : > { %2395 = dma.done.wait (%p2993_p9), [#allocation12], 2048  }
  0xbb   : > { %2397 = vsyncadd (%p2994_p2), [#allocation12], 4294965248  ;;  %v2427_v0 = vmov 0.0   ;;  %vm2428_vm0 = vmmov 0   ;;  %v2104_v1 = vld [vmem:[#allocation10 + $0x38] sm:$0xff]   ;;  %v2106_v3 = vld [vmem:[#allocation10 + $0x30] sm:$0xff]  }
  0xbc   : > { %1880 = vmatprep.subr.bf16.mxu1 %v2427_v0  ;;  %1860 = vmatprep.subr.bf16.mxu0 %v2427_v0  ;;  %v2105_v2 = vld [vmem:[#allocation8 + $0x38] sm:$0xff]   ;;  %v2107_v4 = vld [vmem:[#allocation8 + $0x30] sm:$0xff]   ;;  %v2108_v5 = vld [vmem:[#allocation10 + $0x28] sm:$0xff]   ;;  %vm892_vm1 = vcmask 261120   ;;  %s2429_s29 = smov 96   ;;  %vm939_vm2 = vcmask 64512  }
  0xbd   : > { %1896 = vmatprep.mubr.msk.bf16.mxu1 %vm2428_vm0, %v2427_v0  ;;  %1876 = vmatprep.mubr.msk.bf16.mxu0 %vm2428_vm0, %v2427_v0  ;;  %v2109_v6 = vld [vmem:[#allocation8 + $0x28] sm:$0xff]   ;;  %v2110_v7 = vld [vmem:[#allocation10 + $0x20] sm:$0xff]   ;;  %v2112_v9 = vld [vmem:[#allocation10 + $0x18] sm:$0xff]   ;;  %vm955_vm3 = vcmask 1043456   ;;  %s2430_s27 = smov 64   ;;  %s2431_s3 = smov 32  }
  0xbe   : > { %1881 = vmatpush3.bf16.msra.mxu1 %v2104_v1  ;;  %1861 = vmatpush3.bf16.msra.mxu0 %v2105_v2  ;;  %v2111_v8 = vld [vmem:[#allocation8 + $0x20] sm:$0xff]   ;;  %v2113_v10 = vld [vmem:[#allocation8 + $0x18] sm:$0xff]   ;;  %v2114_v11 = vld [vmem:[#allocation10 + $0x10] sm:$0xff]   ;;  %s2995_s26 = sld [smem:[#allocation24_spill]]  ;;  %s1802_s12 = sshll.u32 %s2514_s23, 7 }
  0xbf   : > { %1882 = vmatprep.subr.bf16.mxu1 %v2427_v0  ;;  %1862 = vmatprep.subr.bf16.mxu0 %v2427_v0  ;;  %v2115_v12 = vld [vmem:[#allocation8 + $0x10] sm:$0xff]   ;;  %v2116_v13 = vld [vmem:[#allocation10 + $0x8] sm:$0xff]   ;;  %v2118_v15 = vld [vmem:[#allocation10] sm:$0xff]   ;;  %s530_s21 = scalar_lea.vmem [#allocation14], %s2709_s20  ;;  %s1567_s13 = scalar_lea.sflag [#allocation4], %s2706_s0 }
  0xc0   : > { %v2117_v14 = vld [vmem:[#allocation8 + $0x8] sm:$0xff]   ;;  %v2119_v17 = vld [vmem:[#allocation8] sm:$0xff]   ;;  %v532_v18 = vld [vmem:[%s448_s1] sm:$0xff]  ;;  %s1580_s1 = sshll.u32 %s530_s21, 4  ;;  %s2432_s20 = smov [#allocation14]   ;;  %s2885_s1 = int_to_ptr.vmem [resolvable:$true] %s1580_s1 }
  0xc1   : > { %v534_v16 = vld [vmem:[%s457_s28] sm:$0xff]  ;;  %v533_v20 = vpack.c.bf16 %v532_v18, %v532_v18  ;;  %v1762_v21 = vld [vmem:[%s2932_s6] ss:$0 sm:$0xff]  ;;  %v2120_v37 = vld [vmem:[#allocation11 + $0x38] sm:$0xff]   ;;  %s2996_s28 = sld [smem:[#allocation30_spill]]  ;;  %s2340_s23 = scalar_lea.vmem %s2885_s1, 128 }
  0xc2   : > { %1883 = vmatpush3.bf16.msra.mxu1 %v2106_v3  ;;  %1863 = vmatpush3.bf16.msra.mxu0 %v2107_v4  ;;  %v535_v19 = vpack.c.bf16 %v534_v16, %v534_v16  ;;  %v1753_v22 = vld [vmem:[%s2930_s4] ss:$0 sm:$0xff]  ;;  %v2122_v39 = vld [vmem:[#allocation11 + $0x28] sm:$0xff]   ;;  %v2123_v40 = vld [vmem:[#allocation11 + $0x20] sm:$0xff]   ;;  %p2341_p5 = scmp.ne.s32.totalorder %s2885_s1, %s2340_s23  ;;  %s2344_s17 = sshll.u32 %s2432_s20, 4  ;;  %s2345_s17 = int_to_ptr.vmem [resolvable:$false] %s2344_s17 }
  0xc3   : > { %1884 = vmatprep.subr.bf16.mxu1 %v2427_v0  ;;  %1864 = vmatprep.subr.bf16.mxu0 %v2427_v0  ;;  %v2121_v38 = vld [vmem:[#allocation11 + $0x30] sm:$0xff]   ;;  %v2124_v41 = vld [vmem:[#allocation11 + $0x18] sm:$0xff]   ;;  %v2126_v43 = vld [vmem:[#allocation11 + $0x8] sm:$0xff]   ;;  %s2346_s14 = scalar_lea.vmem %s2345_s17, 256  ;;  %p2347_p11 = scmp.lt.s32.totalorder %s2885_s1, %s2345_s17 }
  0xc4   : > { %v2125_v42 = vld [vmem:[#allocation11 + $0x10] sm:$0xff]   ;;  %v2127_v44 = vld [vmem:[#allocation11] sm:$0xff]   ;;  %p2997_p1 = scmp.ne.s32.totalorder %s2995_s26, 0  ;;  %p2348_p0 = scmp.lt.s32.totalorder %s2346_s14, %s2340_s23 }
  0xc5   : > { %v536_v45 = vld [vmem:[%s466_s22] sm:$0xff] }
  0xc6   : > { %1885 = vmatpush3.bf16.msra.mxu1 %v2108_v5  ;;  %1865 = vmatpush3.bf16.msra.mxu0 %v2109_v6  ;;  %v537_v46 = vpack.c.bf16 %v536_v45, %v536_v45  ;;  %v1771_v57 = vld [vmem:[%s2934_s8] ss:$0 sm:$0xff]  ;;  %p2342_p8 = pnand %p2341_p5, %p2997_p1  ;;  %p2349_p4 = por %p2348_p0, %p2347_p11 }
  0xc7   : > { %1886 = vmatprep.subr.bf16.mxu1 %v2427_v0  ;;  %1866 = vmatprep.subr.bf16.mxu0 %v2427_v0  ;;  %s2883_s22 = scalar_lea.hbm %s2996_s28, %s1802_s12 }
  0xc8   : > { %p2343_p10 = pneg %p2342_p8 }
  0xca   : > { %1887 = vmatpush3.bf16.msra.mxu1 %v2110_v7  ;;  %1867 = vmatpush3.bf16.msra.mxu0 %v2111_v8  ;;  %p2350_p7 = pnand %p2349_p4, %p2343_p10 }
  0xcb   : > { %1888 = vmatprep.subr.bf16.mxu1 %v2427_v0  ;;  %1868 = vmatprep.subr.bf16.mxu0 %v2427_v0 }
  0xce   : > { %1889 = vmatpush3.bf16.msra.mxu1 %v2112_v9  ;;  %1869 = vmatpush3.bf16.msra.mxu0 %v2113_v10 }
  0xcf   : > { %1890 = vmatprep.subr.bf16.mxu1 %v2427_v0  ;;  %1870 = vmatprep.subr.bf16.mxu0 %v2427_v0 }
  0xd2   : > { %1891 = vmatpush3.bf16.msra.mxu1 %v2114_v11  ;;  %1871 = vmatpush3.bf16.msra.mxu0 %v2115_v12 }
  0xd3   : > { %1892 = vmatprep.subr.bf16.mxu1 %v2427_v0  ;;  %1872 = vmatprep.subr.bf16.mxu0 %v2427_v0 }
  0xd6   : > { %1893 = vmatpush3.bf16.msra.mxu1 %v2116_v13  ;;  %1873 = vmatpush3.bf16.msra.mxu0 %v2117_v14 }
  0xd7   : > { %1894 = vmatprep.subr.bf16.mxu1 %v2427_v0  ;;  %1874 = vmatprep.subr.bf16.mxu0 %v2427_v0 }
  0xda   : > { %1895 = vmatpush3.bf16.msra.mxu1 %v2118_v15  ;;  %1875 = vmatpush3.bf16.msra.mxu0 %v2119_v17 }
  0xdb   : > { %1920 = vmatprep.subr.bf16.mxu1 %v2427_v0  ;;  %1900 = vmatprep.subr.bf16.mxu0 %v2427_v0 }
  0xdd   : > { %1897 = vmatmul.mubr.bf16.vlgmr.msra.gmra.mxu1 %v535_v19  ;;  %1877 = vmatmul.mubr.bf16.vlgmr.msra.gmra.mxu0 %v533_v20 }
  0xde   : > { %1922 = vmatprep.mubr.msk.bf16.mxu1 %vm2428_vm0, %v2427_v0  ;;  %1916 = vmatprep.mubr.msk.bf16.mxu0 %vm2428_vm0, %v2427_v0 }
  0xdf   : > { %1901 = vmatpush3.bf16.msra.mxu0 %v2120_v37 }
  0xe0   : > { %1902 = vmatprep.subr.bf16.mxu0 %v2427_v0 }
  0xe3   : > { %1903 = vmatpush3.bf16.msra.mxu0 %v2121_v38 }
  0xe4   : > { %1904 = vmatprep.subr.bf16.mxu0 %v2427_v0 }
  0xe7   : > { %1905 = vmatpush3.bf16.msra.mxu0 %v2122_v39 }
  0xe8   : > { %1906 = vmatprep.subr.bf16.mxu0 %v2427_v0 }
  0xeb   : > { %1907 = vmatpush3.bf16.msra.mxu0 %v2123_v40 }
  0xec   : > { %1908 = vmatprep.subr.bf16.mxu0 %v2427_v0 }
  0xef   : > { %1909 = vmatpush3.bf16.msra.mxu0 %v2124_v41 }
  0xf0   : > { %1910 = vmatprep.subr.bf16.mxu0 %v2427_v0 }
  0xf3   : > { %1911 = vmatpush3.bf16.msra.mxu0 %v2125_v42 }
  0xf4   : > { %1912 = vmatprep.subr.bf16.mxu0 %v2427_v0 }
  0xf7   : > { %1913 = vmatpush3.bf16.msra.mxu0 %v2126_v43 }
  0xf8   : > { %1914 = vmatprep.subr.bf16.mxu0 %v2427_v0 }
  0xfb   : > { %1915 = vmatpush3.bf16.msra.mxu0 %v2127_v44 }
  0xfc   : > { %1944 = vmatprep.subr.bf16.mxu0 %v2427_v0 }
  0xfe   : > { %1917 = vmatmul.mubr.bf16.vlgmr.msra.gmra.mxu0 %v537_v46 }
  0xff   : > { %1948 = vmatprep.mubr.msk.bf16.mxu0 %vm2428_vm0, %v2427_v0 }
 0x19d   : > { %v756_v23 = vpop.f32.mrf.mxu1  ;;  %v643_v25 = vpop.f32.mrf.mxu0 }
 0x19e   : > { %v757_v24 = vadd.f32 %v1762_v21, %v756_v23  ;;  %v644_v26 = vadd.f32 %v1753_v22, %v643_v25  ;;  %v2130_v25 = vld [vmem:[#allocation13 + $0x18] sm:$0xff]  }
 0x19f   : > { %v1898_v27 = vpop.f32.mrf.mxu1  ;;  %v1878_v29 = vpop.f32.mrf.mxu0  ;;  %1945 = vmatpush3.bf16.msra.mxu0 %v2130_v25 }
 0x1a0   : > { %v2768_v28 = vpack.c.bf16 %v757_v24, %v757_v24  ;;  %v649_v30 = vmul.f32 0.17677669, %v644_v26  ;;  %v2131_v26 = vld [vmem:[#allocation13 + $0x10] sm:$0xff]   ;;  %1946 = vmatprep.subr.bf16.mxu0 %v2427_v0 }
 0x1a1   : > { %v759_v31 = vpop.f32.mrf.mxu1  ;;  %v646_v32 = vpop.f32.mrf.mxu0 }
 0x1a2   : > { %1004 = vrot.lane.b32.xlu1 %v2768_v28, %s2429_s29  ;;  %v897_v33 = vsel %vm892_vm1, %v2768_v28, 0  ;;  %v2774_v34 = vpack.c.bf16 %v649_v30, %v649_v30  ;;  %v2128_v31 = vld [vmem:[#allocation13 + $0x8] sm:$0xff]  }
 0x1a3   : > { %v1899_v35 = vpop.f32.mrf.mxu1  ;;  %1921 = vmatpush3.bf16.xpose.msra.mxu1 %v897_v33  ;;  %v1879_v36 = vpop.f32.mrf.mxu0  ;;  %1947 = vmatpush3.bf16.msra.mxu0 %v2131_v26  ;;  %v2129_v33 = vld [vmem:[#allocation13] sm:$0xff]  }
 0x1a4   : > { %1926 = vmatprep.subr.bf16.mxu1 %v2427_v0  ;;  %1960 = vmatprep.subr.bf16.mxu0 %v2427_v0 }
 0x1a6   : > { %1001 = vrot.lane.b32.xlu1 %v2774_v34, %s2429_s29 }
 0x1aa   : > { %1923 = vmatmul.mubr.msk.bf16.vlgmr.msra.gmra.mxu1 %vm892_vm1, %v2774_v34 }
 0x1ab   : > { %1928 = vmatprep.mubr.msk.bf16.mxu1 %vm2428_vm0, %v2427_v0 }
 0x1be   : > { %v868_v58 = vpop.f32.mrf.mxu0 }
 0x1bf   : > { %v869_v59 = vadd.f32 %v1771_v57, %v868_v58 }
 0x1c0   : > { %v1918_v60 = vpop.f32.mrf.mxu0 }
 0x1c1   : > { %v2800_v61 = vpack.c.bf16 %v869_v59, %v869_v59 }
 0x1c2   : > { %v871_v62 = vpop.f32.mrf.mxu0 }
 0x1c3   : > { %v957_v63 = vsel %vm955_vm3, %v2800_v61, 0 }
 0x1c4   : > { %v1919_v1 = vpop.f32.mrf.mxu0  ;;  %1927 = vmatpush3.bf16.msra.mxu1 %v957_v63 }
 0x1c5   : > { %1932 = vmatprep.subr.bf16.mxu1 %v2427_v0 }
 0x214   : > { %v1005_v5 = vpop.permute.xlu1 %1004 }
 0x215   : > { %v1010_v7 = vsel %vm892_vm1, %v1005_v5, 0 }
 0x218   : > { %v1002_v8 = vpop.permute.xlu1 %1001 }
 0x26a   : > { %v933_v47 = vpop.f32.mrf.mxu1 }
 0x26b   : > { %v940_v48 = vsel %vm939_vm2, %v933_v47, -inf }
 0x26c   : > { %941 = vmax.xlane.f32.xlu0 %v940_v48  ;;  %v1924_v49 = vpop.f32.mrf.mxu1 }
 0x26e   : > { %v936_v50 = vpop.f32.mrf.mxu1 }
 0x270   : > { %v1925_v51 = vpop.f32.mrf.mxu1 }
 0x2f5   : > { %v942_v52 = vpop.xlane.xlu0 %941 }
 0x2f6   : > { %v943_v53 = vsub.f32 %v933_v47, %v942_v52 }
 0x2f8   : > { %v944_v54 = vmul.f32 1.442695, %v943_v53 }
 0x2fa   : > { %2136 = vpow2.f32 %v944_v54 }
 0x307   : > { %v2137_v55 = vpop.eup %2136 }
 0x308   : > { %v946_v56 = vsel %vm939_vm2, %v2137_v55, 0.0 }
 0x309   : > { %947 = vadd.xlane.f32.xlu0 %v946_v56 }
 0x392   : > { %v948_v2 = vpop.xlane.xlu0 %947 }
 0x393   : > { %2138 = vrcp.f32 %v948_v2  ;;  %v2132_v2 = vld [vmem:[#allocation13 + $0x28] sm:$0xff]  }
 0x3a0   : > { %v2139_v3 = vpop.eup %2138 }
 0x3a1   : > { %v950_v4 = vmul.f32 %v2139_v3, %v2137_v55 }
 0x3a3   : > { %v951_v6 = vpack.c.bf16 %v950_v4, %v950_v4 }
 0x3a5   : > { %1929 = vmatmul.mubr.msk.bf16.vlgmr.msra.gmra.mxu1 %vm939_vm2, %v951_v6 }
 0x3a6   : > { %1933 = vmatpush3.bf16.xpose.msra.mxu1 %v1010_v7  ;;  %1934 = vmatprep.mubr.msk.bf16.mxu1 %vm2428_vm0, %v2427_v0 }
 0x3a7   : > { %1938 = vmatprep.subr.bf16.mxu1 %v2427_v0 }
 0x3ad   : > { %1935 = vmatmul.mubr.msk.bf16.vlgmr.msra.gmra.mxu1 %vm892_vm1, %v1002_v8 }
 0x3ae   : > { %1940 = vmatprep.mubr.msk.bf16.mxu1 %vm2428_vm0, %v2427_v0 }
 0x465   : > { %v993_v9 = vpop.f32.mrf.mxu1 }
 0x466   : > { %v999_v36 = vpack.c.bf16 %v993_v9, %v993_v9 }
 0x467   : > { %v1930_v10 = vpop.f32.mrf.mxu1 }
 0x469   : > { %v996_v11 = vpop.f32.mrf.mxu1 }
 0x46b   : > { %v1931_v12 = vpop.f32.mrf.mxu1 }
 0x46d   : > { %v1046_v13 = vpop.f32.mrf.mxu1 }
 0x46e   : > { %v1052_v14 = vsel %vm939_vm2, %v1046_v13, -inf }
 0x46f   : > { %1053 = vmax.xlane.f32.xlu0 %v1052_v14  ;;  %v1936_v15 = vpop.f32.mrf.mxu1 }
 0x471   : > { %v1049_v16 = vpop.f32.mrf.mxu1 }
 0x473   : > { %v1937_v17 = vpop.f32.mrf.mxu1 }
 0x485   : > { %1065 = vrot.lane.b32.xlu0 %v2800_v61, %s2429_s29 }
 0x489   : > { %1226 = vrot.lane.b32.xlu0 %v2768_v28, %s2430_s27 }
 0x48d   : > { %1224 = vrot.lane.b32.xlu0 %v2774_v34, %s2430_s27 }
 0x4f8   : > { %v1054_v18 = vpop.xlane.xlu0 %1053 }
 0x4f9   : > { %v1055_v19 = vsub.f32 %v1046_v13, %v1054_v18 }
 0x4fb   : > { %v1056_v20 = vmul.f32 1.442695, %v1055_v19 }
 0x4fc   : > { %v1066_v21 = vpop.permute.xlu0 %1065 }
 0x4fd   : > { %2140 = vpow2.f32 %v1056_v20  ;;  %v1071_v22 = vsel %vm955_vm3, %v1066_v21, 0 }
 0x4fe   : > { %1939 = vmatpush3.bf16.msra.mxu1 %v1071_v22 }
 0x4ff   : > { %1952 = vmatprep.subr.bf16.mxu1 %v2427_v0 }
 0x500   : > { %v1227_v38 = vpop.permute.xlu0 %1226 }
 0x501   : > { %v1232_v42 = vsel %vm892_vm1, %v1227_v38, 0  ;;  %v2135_v38 = vld [vmem:[#allocation13 + $0x30] sm:$0xff]  }
 0x504   : > { %v1225_v46 = vpop.permute.xlu0 %1224 }
 0x50a   : > { %v2141_v23 = vpop.eup %2140 }
 0x50b   : > { %v1058_v24 = vsel %vm939_vm2, %v2141_v23, 0.0 }
 0x50c   : > { %1059 = vadd.xlane.f32.xlu1 %v1058_v24 }
 0x51d   : > { %1286 = vrot.lane.b32.xlu1 %v2800_v61, %s2430_s27 }
 0x595   : > { %v1060_v27 = vpop.xlane.xlu1 %1059 }
 0x596   : > { %2142 = vrcp.f32 %v1060_v27 }
 0x599   : > { %v1287_v35 = vpop.permute.xlu1 %1286 }
 0x59a   : > { %v1292_v37 = vsel %vm955_vm3, %v1287_v35, 0 }
 0x5a3   : > { %v2143_v29 = vpop.eup %2142 }
 0x5a4   : > { %v1062_v30 = vmul.f32 %v2143_v29, %v2141_v23  ;;  %v2134_v29 = vld [vmem:[#allocation13 + $0x38] sm:$0xff]  }
 0x5a6   : > { %v1063_v32 = vpack.c.bf16 %v1062_v30, %v1062_v30 }
 0x5a8   : > { %1941 = vmatmul.mubr.msk.bf16.vlgmr.msra.gmra.mxu1 %vm939_vm2, %v1063_v32 }
 0x5a9   : > { %1953 = vmatpush3.bf16.msra.mxu1 %v2128_v31  ;;  %1956 = vmatprep.mubr.msk.bf16.mxu1 %vm2428_vm0, %v2427_v0 }
 0x5aa   : > { %1954 = vmatprep.subr.bf16.mxu1 %v2427_v0 }
 0x5ad   : > { %1955 = vmatpush3.bf16.msra.mxu1 %v2129_v33 }
 0x5ae   : > { %1966 = vmatprep.subr.bf16.mxu1 %v2427_v0 }
 0x5b0   : > { %1957 = vmatmul.mubr.msk.bf16.vlgmr.msra.gmra.mxu1 %vm892_vm1, %v999_v36 }
 0x5b1   : > { %1967 = vmatpush3.bf16.msra.mxu1 %v1292_v37  ;;  %1968 = vmatprep.mubr.msk.bf16.mxu1 %vm2428_vm0, %v2427_v0 }
 0x5b2   : > { %1980 = vmatprep.subr.bf16.mxu1 %v2427_v0 }
 0x668   : > { %v1107_v39 = vpop.f32.mrf.mxu1 }
 0x669   : > { %v1113_v40 = vpack.c.bf16 %v1107_v39, %v1107_v39 }
 0x66a   : > { %v1942_v41 = vpop.f32.mrf.mxu1 }
 0x66b   : > { %1949 = vmatmul.mubr.msk.bf16.vlgmr.msra.gmra.mxu0 %vm892_vm1, %v1113_v40 }
 0x66c   : > { %1961 = vmatpush3.bf16.xpose.msra.mxu0 %v1232_v42  ;;  %v1110_v43 = vpop.f32.mrf.mxu1  ;;  %1962 = vmatprep.mubr.msk.bf16.mxu0 %vm2428_vm0, %v2427_v0 }
 0x66d   : > { %1972 = vmatprep.subr.bf16.mxu0 %v2427_v0  ;;  %v1800_v43 = vld [vmem:[%s2936_s10] ss:$0 sm:$0xff] }
 0x66e   : > { %v1943_v44 = vpop.f32.mrf.mxu1 }
 0x670   : > { %v2839_v45 = vpop.f32.mrf.mxu1 }
 0x672   : > { %v1958_v47 = vpop.f32.mrf.mxu1 }
 0x673   : > { %1963 = vmatmul.mubr.msk.bf16.vlgmr.msra.gmra.mxu0 %vm892_vm1, %v1225_v46 }
 0x674   : > { %v1221_v48 = vpop.f32.mrf.mxu1  ;;  %1976 = vmatprep.mubr.msk.bf16.mxu0 %vm2428_vm0, %v2427_v0  ;;  %1973 = vmatpush3.bf16.msra.mxu0 %v2132_v2 }
 0x675   : > { %1974 = vmatprep.subr.bf16.mxu0 %v2427_v0 }
 0x676   : > { %v1959_v49 = vpop.f32.mrf.mxu1 }
 0x72b   : > { %v2844_v50 = vpop.f32.mrf.mxu0 }
 0x72c   : > { %v1219_v26 = vadd.f32 %v2839_v45, %v2844_v50 }
 0x72d   : > { %v1950_v51 = vpop.f32.mrf.mxu0 }
 0x72f   : > { %v1166_v52 = vpop.f32.mrf.mxu0 }
 0x731   : > { %v1951_v53 = vpop.f32.mrf.mxu0 }
 0x733   : > { %v1268_v54 = vpop.f32.mrf.mxu0 }
 0x734   : > { %v1274_v55 = vsel %vm939_vm2, %v1268_v54, -inf }
 0x735   : > { %1275 = vmax.xlane.f32.xlu0 %v1274_v55  ;;  %v1964_v56 = vpop.f32.mrf.mxu0 }
 0x737   : > { %v1271_v57 = vpop.f32.mrf.mxu0 }
 0x739   : > { %v1965_v58 = vpop.f32.mrf.mxu0 }
 0x7be   : > { %v1276_v59 = vpop.xlane.xlu0 %1275 }
 0x7bf   : > { %v1277_v60 = vsub.f32 %v1268_v54, %v1276_v59 }
 0x7c1   : > { %v1278_v62 = vmul.f32 1.442695, %v1277_v60 }
 0x7c3   : > { %2144 = vpow2.f32 %v1278_v62 }
 0x7d0   : > { %v2145_v63 = vpop.eup %2144 }
 0x7d1   : > { %v1280_v1 = vsel %vm939_vm2, %v2145_v63, 0.0 }
 0x7d2   : > { %1281 = vadd.xlane.f32.xlu1 %v1280_v1 }
 0x7e3   : > { %1393 = vrot.lane.b32.xlu1 %v2768_v28, %s2431_s3 }
 0x7e7   : > { %1391 = vrot.lane.b32.xlu1 %v2774_v34, %s2431_s3  ;;  %v2133_v34 = vld [vmem:[#allocation13 + $0x20] sm:$0xff]  }
 0x7e8   : > { %1975 = vmatpush3.bf16.msra.mxu0 %v2133_v34 }
 0x7e9   : > { %1986 = vmatprep.subr.bf16.mxu0 %v2427_v0 }
 0x85b   : > { %v1282_v3 = vpop.xlane.xlu1 %1281 }
 0x85c   : > { %2146 = vrcp.f32 %v1282_v3 }
 0x85f   : > { %v1394_v6 = vpop.permute.xlu1 %1393 }
 0x860   : > { %v1399_v8 = vsel %vm892_vm1, %v1394_v6, 0 }
 0x863   : > { %v1392_v28 = vpop.permute.xlu1 %1391 }
 0x869   : > { %v2147_v4 = vpop.eup %2146 }
 0x86a   : > { %v1284_v5 = vmul.f32 %v2147_v4, %v2145_v63 }
 0x86c   : > { %v1285_v7 = vpack.c.bf16 %v1284_v5, %v1284_v5 }
 0x86e   : > { %1969 = vmatmul.mubr.msk.bf16.vlgmr.msra.gmra.mxu1 %vm939_vm2, %v1285_v7 }
 0x86f   : > { %1981 = vmatpush3.bf16.xpose.msra.mxu1 %v1399_v8  ;;  %1982 = vmatprep.mubr.msk.bf16.mxu1 %vm2428_vm0, %v2427_v0 }
 0x870   : > { %1992 = vmatprep.subr.bf16.mxu1 %v2427_v0 }
 0x876   : > { %1983 = vmatmul.mubr.msk.bf16.vlgmr.msra.gmra.mxu1 %vm892_vm1, %v1392_v28 }
 0x877   : > { %1996 = vmatprep.mubr.msk.bf16.mxu1 %vm2428_vm0, %v2427_v0  ;;  %1993 = vmatpush3.bf16.msra.mxu1 %v2134_v29 }
 0x878   : > { %1994 = vmatprep.subr.bf16.mxu1 %v2427_v0 }
 0x87b   : > { %1995 = vmatpush3.bf16.msra.mxu1 %v2135_v38 }
 0x92e   : > { %v1328_v9 = vpop.f32.mrf.mxu1 }
 0x92f   : > { %v1334_v10 = vpack.c.bf16 %v1328_v9, %v1328_v9 }
 0x930   : > { %v1970_v11 = vpop.f32.mrf.mxu1 }
 0x931   : > { %1977 = vmatmul.mubr.msk.bf16.vlgmr.msra.gmra.mxu0 %vm892_vm1, %v1334_v10 }
 0x932   : > { %v1331_v12 = vpop.f32.mrf.mxu1  ;;  %1988 = vmatprep.mubr.msk.bf16.mxu0 %vm2428_vm0, %v2427_v0 }
 0x934   : > { %v1971_v13 = vpop.f32.mrf.mxu1 }
 0x936   : > { %v1435_v14 = vpop.f32.mrf.mxu1 }
 0x937   : > { %v1441_v15 = vsel %vm939_vm2, %v1435_v14, -inf }
 0x938   : > { %1442 = vmax.xlane.f32.xlu0 %v1441_v15  ;;  %v1984_v16 = vpop.f32.mrf.mxu1 }
 0x93a   : > { %v1438_v17 = vpop.f32.mrf.mxu1 }
 0x93c   : > { %v1985_v18 = vpop.f32.mrf.mxu1 }
 0x94e   : > { %1453 = vrot.lane.b32.xlu0 %v2800_v61, %s2431_s3 }
 0x9c1   : > { %v1443_v19 = vpop.xlane.xlu0 %1442 }
 0x9c2   : > { %v1444_v20 = vsub.f32 %v1435_v14, %v1443_v19 }
 0x9c4   : > { %v1445_v21 = vmul.f32 1.442695, %v1444_v20 }
 0x9c5   : > { %v1454_v22 = vpop.permute.xlu0 %1453 }
 0x9c6   : > { %2148 = vpow2.f32 %v1445_v21  ;;  %v1459_v23 = vsel %vm955_vm3, %v1454_v22, 0 }
 0x9c7   : > { %1987 = vmatpush3.bf16.msra.mxu0 %v1459_v23 }
 0x9d3   : > { %v2149_v24 = vpop.eup %2148 }
 0x9d4   : > { %v1447_v25 = vsel %vm939_vm2, %v2149_v24, 0.0 }
 0x9d5   : > { %1448 = vadd.xlane.f32.xlu1 %v1447_v25 }
 0x9f1   : > { %v1384_v27 = vpop.f32.mrf.mxu0 }
 0x9f2   : > { %v1390_v30 = vadd.f32 %v1384_v27, %v1219_v26 }
 0x9f3   : > { %v1978_v31 = vpop.f32.mrf.mxu0 }
 0x9f5   : > { %v1387_v61 = vpop.f32.mrf.mxu0 }
 0x9f7   : > { %v1979_v32 = vpop.f32.mrf.mxu0 }
 0xa5e   : > { %v1449_v33 = vpop.xlane.xlu1 %1448 }
 0xa5f   : > { %2150 = vrcp.f32 %v1449_v33 }
 0xa6c   : > { %v2151_v35 = vpop.eup %2150 }
 0xa6d   : > { %v1451_v36 = vmul.f32 %v2151_v35, %v2149_v24 }
 0xa6f   : > { %v1452_v37 = vpack.c.bf16 %v1451_v36, %v1451_v36 }
 0xa71   : > { %1989 = vmatmul.mubr.msk.bf16.vlgmr.msra.gmra.mxu0 %vm939_vm2, %v1452_v37 }
 0xb31   : > { %v1495_v39 = vpop.f32.mrf.mxu0 }
 0xb32   : > { %v1501_v40 = vpack.c.bf16 %v1495_v39, %v1495_v39 }
 0xb33   : > { %v1990_v41 = vpop.f32.mrf.mxu0 }
 0xb34   : > { %1997 = vmatmul.mubr.msk.bf16.vlgmr.msra.gmra.mxu1 %vm892_vm1, %v1501_v40 }
 0xb35   : > { %v1498_v0 = vpop.f32.mrf.mxu0 }
 0xb37   : > { %v1991_v42 = vpop.f32.mrf.mxu0 }
 0xbf4   : > { %v1551_v44 = vpop.f32.mrf.mxu1 }
 0xbf5   : > { %v1557_v45 = vadd.f32 %v1551_v44, %v1390_v30 }
 0xbf6   : > { %v1998_v46 = vpop.f32.mrf.mxu1 }
 0xbf7   : > { %v1564_v47 = vadd.f32 %v1800_v43, %v1557_v45 }
 0xbf8   : > { %v1554_v48 = vpop.f32.mrf.mxu1 }
 0xbf9   : > { %1565 = vst [vmem:[%s530_s21] sm:$0xff] %v1564_v47 }
 0xbfa   : > { %v1999_v49 = vpop.f32.mrf.mxu1 }
 0xbfb   : > { %2353 = shalt.err (!%p2350_p7)
}
 0xbfc   : > { %s2354_s7 = scalar_lea.hbm %s2883_s22, 128  ;;  %s2358_s30 = scalar_lea.hbm %s2996_s28, 256 }
 0xbfd   : > { %p2355_p3 = scmp.ne.s32.totalorder %s2883_s22, %s2354_s7  ;;  %p2359_p6 = scmp.lt.s32.totalorder %s2883_s22, %s2996_s28 }
 0xbfe   : > { %p2360_p9 = scmp.lt.s32.totalorder %s2358_s30, %s2354_s7 }
 0xbff   : > { %p2356_p12 = pnand %p2355_p3, %p2997_p1 }
 0xc00   : > { %p2361_p2 = por %p2360_p9, %p2359_p6 }
 0xc01   : > { %p2357_p13 = pneg %p2356_p12 }
 0xc03   : > { %p2362_p5 = pnand %p2361_p2, %p2357_p13 }
 0xc05   : > { %2365 = shalt.err (!%p2362_p5)
}
 0xc06   : > { %2022 = dma.vmem_to_hbm [thread:$0]  (%p2997_p1), %s2885_s1, 128, %s2883_s22, %s1567_s13  }
 0xc07 PF: > { %s2998_s3 = sld [smem:[#allocation20_spill]] }
 0xc08   : > { %s2999_s16 = sld [smem:[#allocation25_spill]] }
 0xc09   : > { %s3000_s25 = sld [smem:[#allocation21_spill]] }
 0xc0d   : > { %s1592_s12 = sand.u32 1, %s2998_s3  }
 0xc0e   : > { %p3001_p8 = scmp.ne.s32.totalorder %s2999_s16, 0  ;;  %s1593_s21 = scalar_lea.sflag [#allocation4], %s1592_s12 }
 0xc0f   : > { %p3002_p10 = scmp.ge.s32.totalorder %s3000_s25, 2 }
 0xc11   : > { %p2048_p11 = pnand %p3002_p10, %p3001_p8 }
 0xc13   : > { %p2049_p0 = pneg %p2048_p11 }
 0xc15   : > { %2399 = dma.done.wait (%p2049_p0), %s1593_s21, 128  }
 0xc16   : > { %2401 = vsyncadd (%p2049_p0), %s1593_s21, 4294967168  ;;  %s3003_s20 = sld [smem:[#allocation22_spill]]  ;;  %s3005_s17 = smov %s2408_s18 }
 0xc17   : > { %s3004_s24 = sld [smem:[#allocation23_spill]]  ;;  %s3006_s18 = smov %s2412_s19 }
 0xc1c   : > { %p29_p4 = scmp.ge.s32.totalorder %s3003_s20, 4  }
 0xc1d   : > { %s3007_s19 = smov %s3004_s24 }
 0xc1e   :  { %31 = sbr.rel (!%p29_p4) target bundleno = 15 (0xf), region = 149 }
 0xc23   :  { %1598 = vsyncpa [#allocation3], 1 }
 0xc24   :  { %1600 = vsyncpa [#allocation3 + $0x1], 1 }
 0xc25   :  { %1601 = vsyncpa [#allocation6], 1 }
 0xc26   :  { %1603 = vsyncpa [#allocation6 + $0x1], 1 }
 0xc27   :  { %1604 = vsyncpa [#allocation9], 1 }
 0xc28   :  { %1605 = vsyncpa [#allocation12], 1 }
 0xc29   :  { %1606 = vsyncpa [#allocation4], 1 }
 0xc2a   :  { %1608 = vsyncpa [#allocation4 + $0x1], 1 }

</bundles_post_ra>
